<compile_context>
chip_gen: v7x
topology: tpu7x:2x2x1
jax: 0.10.0
libtpu: 0.0.40
codegen_flags: <defaults>
</compile_context>

<pallas_src>
import jax
import jax.numpy as jnp
from jax.experimental import pallas as pl
from jax.experimental.pallas import tpu as pltpu

HIDDEN = 768        # BERT hidden size (fc1 input)
FC1_OUT = 192
FC1_PAD = 256       # fc1 width zero-padded to a full MXU tile (192 -> 256)
NUM_CLASSES = 4
OUT_PAD = 128       # lane-dense padded logits width


def _round_up(x, m):
    return ((x + m - 1) // m) * m


def classifier_kernel(emb_ref, cnt_ref, wp_ref, bp_ref,
                      w1_ref, b1_ref, w2_ref, b2_ref,
                      out_ref, sum_acc):
    # emb_ref:  [TB, TS, H]  bf16 mask-pre-multiplied token embeddings
    # cnt_ref:  [TB, 1]      f32 per-row real-token counts (precomputed)
    # sum_acc:  [TB, H]      f32 scratch, masked sum over sequence
    j = pl.program_id(1)

    @pl.when(j == 0)
    def _init():
        sum_acc[...] = jnp.zeros_like(sum_acc)

    # Mask is already folded into emb; fuse the bf16->f32 upcast into the
    # sequence reduction (no full-tile f32 intermediate, no VPU multiply).
    sum_acc[...] += jnp.sum(emb_ref[...], axis=1, dtype=jnp.float32)   # [TB, H]

    @pl.when(j == pl.num_programs(1) - 1)
    def _finalize():
        # masked mean pooling (clamp count: all-pad rows would divide by 0).
        # Exact divide — runs once per batch tile, so it is free.
        count = jnp.maximum(cnt_ref[...], 1.0)            # [TB, 1]
        pooled = sum_acc[...] / count                     # [TB, H]

        cdt = wp_ref.dtype   # bf16 compute dtype for MXU inputs

        # --- BERT-style pooler: tanh(pooled @ Wp + bp) ---
        pooler = jnp.tanh(
            jnp.dot(pooled.astype(cdt), wp_ref[...],
                    preferred_element_type=jnp.float32) + bp_ref[...])

        # --- fc1: [TB,768] @ [768,256(pad)] + b1 ; ReLU ---
        h = jnp.dot(pooler.astype(cdt), w1_ref[...],
                    preferred_element_type=jnp.float32) + b1_ref[...]
        h = jnp.maximum(h, 0.0)

        # dropout(p=0.1): inference-mode identity

        # --- fc2: [TB,256(pad)] @ [256,128(pad)] + b2 ---
        logits = jnp.dot(h.astype(cdt), w2_ref[...],
                         preferred_element_type=jnp.float32) + b2_ref[...]
        out_ref[...] = logits.astype(out_ref.dtype)


def text_classifier_forward(emb, mask, wp, bp, w1, b1, w2, b2,
                            *, tb=128, ts=64, param_dtype=jnp.bfloat16):
    B, S, H = emb.shape
    assert H == HIDDEN

    # tile sizes (cap at the padded array extents; multiples of 8 sublanes)
    tb = min(tb, _round_up(B, 8))
    ts = min(ts, _round_up(S, 8))
    b_pad = _round_up(B, tb)
    s_pad = _round_up(S, ts)

    # Fold the attention mask into emb during the single bf16 cast pass; pad
    # only when the shapes are not already tile multiples (no extra HBM copy
    # when the producer already emits bf16 padded data).
    emb_m = emb.astype(param_dtype) * mask[:, :, None].astype(param_dtype)
    if (b_pad, s_pad) != (B, S):
        emb_m = jnp.pad(emb_m, ((0, b_pad - B), (0, s_pad - S), (0, 0)))

    # Per-row token counts, computed once in plain JAX (tiny [b_pad, 1] f32).
    counts = jnp.sum(mask.astype(jnp.float32), axis=1, keepdims=True)   # [B,1]
    if b_pad != B:
        counts = jnp.pad(counts, ((0, b_pad - B), (0, 0)))

    # Weights: bf16 storage, biases f32; fc1/fc2 zero-padded to MXU-friendly
    # shapes (192 -> 256 inner width, 4 -> 128 lane-dense logits).
    wp_c = wp.astype(param_dtype)
    bp_c = bp.reshape(1, HIDDEN).astype(jnp.float32)
    w1_p = jnp.zeros((HIDDEN, FC1_PAD), param_dtype)
    w1_p = w1_p.at[:, :FC1_OUT].set(w1.astype(param_dtype))
    b1_p = jnp.zeros((1, FC1_PAD), jnp.float32)
    b1_p = b1_p.at[0, :FC1_OUT].set(b1.reshape(-1).astype(jnp.float32))
    w2_p = jnp.zeros((FC1_PAD, OUT_PAD), param_dtype)
    w2_p = w2_p.at[:FC1_OUT, :NUM_CLASSES].set(w2.astype(param_dtype))
    b2_p = jnp.zeros((1, OUT_PAD), jnp.float32)
    b2_p = b2_p.at[0, :NUM_CLASSES].set(b2.reshape(-1).astype(jnp.float32))

    grid = (b_pad // tb, s_pad // ts)

    # Size the scoped VMEM limit to the real footprint (double-buffered emb
    # tiles dominate) plus headroom; stays below v7x's 64 MiB per-core VMEM
    # at the default tiles and above v5e's 16 MiB default scoped limit.
    itemsize = jnp.dtype(param_dtype).itemsize
    emb_tile_bytes = tb * ts * HIDDEN * itemsize
    weight_bytes = (HIDDEN * HIDDEN + HIDDEN * FC1_PAD + FC1_PAD * OUT_PAD) * itemsize
    vmem_limit = int(2 * emb_tile_bytes + 2 * weight_bytes + (8 << 20))

    out = pl.pallas_call(
        classifier_kernel,
        out_shape=jax.ShapeDtypeStruct((b_pad, OUT_PAD), jnp.float32),
        grid_spec=pltpu.PrefetchScalarGridSpec(
            num_scalar_prefetch=0,
            grid=grid,
            in_specs=[
                pl.BlockSpec((tb, ts, HIDDEN), lambda i, j: (i, j, 0)),   # emb (masked)
                pl.BlockSpec((tb, 1), lambda i, j: (i, 0)),               # token counts
                pl.BlockSpec((HIDDEN, HIDDEN), lambda i, j: (0, 0)),      # wp (resident)
                pl.BlockSpec((1, HIDDEN), lambda i, j: (0, 0)),           # bp
                pl.BlockSpec((HIDDEN, FC1_PAD), lambda i, j: (0, 0)),     # w1 (padded)
                pl.BlockSpec((1, FC1_PAD), lambda i, j: (0, 0)),          # b1 (padded)
                pl.BlockSpec((FC1_PAD, OUT_PAD), lambda i, j: (0, 0)),    # w2 (padded)
                pl.BlockSpec((1, OUT_PAD), lambda i, j: (0, 0)),          # b2 (padded)
            ],
            out_specs=pl.BlockSpec((tb, OUT_PAD), lambda i, j: (i, 0)),
            scratch_shapes=[
                pltpu.VMEM((tb, HIDDEN), jnp.float32),   # masked-sum accumulator
            ],
        ),
        compiler_params=pltpu.CompilerParams(
            dimension_semantics=("parallel", "arbitrary"),
            vmem_limit_bytes=vmem_limit,
        ),
    )(emb_m, counts, wp_c, bp_c, w1_p, b1_p, w2_p, b2_p)

    # Padded batch rows (>= B) hold garbage logits; discarded by this slice.
    return out[:B, :NUM_CLASSES]


def reference_forward(emb, mask, wp, bp, w1, b1, w2, b2,
                      param_dtype=jnp.bfloat16):
    # Mirror the kernel's bf16 rounding of MXU inputs, f32 accumulation.
    f32 = jnp.float32
    emb_m = (emb.astype(param_dtype)
             * mask[:, :, None].astype(param_dtype)).astype(f32)
    wp = wp.astype(param_dtype).astype(f32)
    w1 = w1.astype(param_dtype).astype(f32)
    w2 = w2.astype(param_dtype).astype(f32)
    count = jnp.maximum(jnp.sum(mask.astype(f32), axis=1, keepdims=True), 1.0)
    pooled = jnp.sum(emb_m, axis=1) / count
    pooler = jnp.tanh(pooled.astype(param_dtype).astype(f32) @ wp + bp)
    h = jnp.maximum(pooler.astype(param_dtype).astype(f32) @ w1 + b1, 0.0)
    return h.astype(param_dtype).astype(f32) @ w2 + b2


if __name__ == "__main__":
    B, S, VOCAB = 2, 8, 100

    key = jax.random.PRNGKey(0)
    k_tok, k_emb, k_wp, k_bp, k_w1, k_b1, k_w2, k_b2 = jax.random.split(key, 8)

    # synthetic inputs (converted_titles token ids + attention masks)
    token_ids = jax.random.randint(k_tok, (B, S), 0, VOCAB)
    mask = jnp.ones((B, S), jnp.float32).at[1, 6:].set(0.0)   # pad tail of sample 1

    # deterministic parameters; embedding table stored in bf16 so the gather
    # already yields the kernel's streaming dtype (no extra HBM copy).
    emb_table = (jax.random.normal(k_emb, (VOCAB, HIDDEN), jnp.float32) * 0.02
                 ).astype(jnp.bfloat16)
    wp = jax.random.normal(k_wp, (HIDDEN, HIDDEN), jnp.float32) * 0.02
    bp = jax.random.normal(k_bp, (1, HIDDEN), jnp.float32) * 0.02
    w1 = jax.random.normal(k_w1, (HIDDEN, FC1_OUT), jnp.float32) * 0.02
    b1 = jax.random.normal(k_b1, (1, FC1_OUT), jnp.float32) * 0.02
    w2 = jax.random.normal(k_w2, (FC1_OUT, NUM_CLASSES), jnp.float32) * 0.02
    b2 = jax.random.normal(k_b2, (1, NUM_CLASSES), jnp.float32) * 0.02

    # embedding lookup (glue outside the kernel; stands in for the BERT encoder)
    emb = jnp.take(emb_table, token_ids, axis=0)   # [B, S, HIDDEN] bf16

    out = text_classifier_forward(emb, mask, wp, bp, w1, b1, w2, b2)
    out = jax.block_until_ready(out)

    ref = reference_forward(emb, mask, wp, bp, w1, b1, w2, b2)
    assert out.shape == (B, NUM_CLASSES)
    assert jnp.allclose(out, ref, atol=5e-4, rtol=2e-2), (out, ref)

    print("KERNEL_OK")
</pallas_src>

<mosaic_0001>
module attributes {stable_mosaic.version = 11 : i64} {
  func.func @classifier_kernel(%arg0: i32, %arg1: i32, %arg2: memref<8x8x768xbf16, #tpu.memory_space<vmem>>, %arg3: memref<8x1xf32, #tpu.memory_space<vmem>>, %arg4: memref<768x768xbf16, #tpu.memory_space<vmem>>, %arg5: memref<1x768xf32, #tpu.memory_space<vmem>>, %arg6: memref<768x256xbf16, #tpu.memory_space<vmem>>, %arg7: memref<1x256xf32, #tpu.memory_space<vmem>>, %arg8: memref<256x128xbf16, #tpu.memory_space<vmem>>, %arg9: memref<1x128xf32, #tpu.memory_space<vmem>>, %arg10: memref<8x128xf32, #tpu.memory_space<vmem>>, %arg11: memref<8x768xf32, #tpu.memory_space<vmem>>) attributes {dimension_semantics = [#tpu.dimension_semantics<parallel>, #tpu.dimension_semantics<arbitrary>], iteration_bounds = array<i64: 1, 1>, scalar_prefetch = 0 : i64, scratch_operands = 1 : i64, tpu.core_type = #tpu.core_type<tc>, window_params = [{transform_indices = @transform_0, window_bounds = array<i64: 8, 8, 768>}, {transform_indices = @transform_1, window_bounds = array<i64: 8, 1>}, {pipeline_mode = #tpu.pipeline_mode<synchronous>, transform_indices = @transform_2, window_bounds = array<i64: 768, 768>}, {pipeline_mode = #tpu.pipeline_mode<synchronous>, transform_indices = @transform_3, window_bounds = array<i64: 1, 768>}, {pipeline_mode = #tpu.pipeline_mode<synchronous>, transform_indices = @transform_4, window_bounds = array<i64: 768, 256>}, {pipeline_mode = #tpu.pipeline_mode<synchronous>, transform_indices = @transform_5, window_bounds = array<i64: 1, 256>}, {pipeline_mode = #tpu.pipeline_mode<synchronous>, transform_indices = @transform_6, window_bounds = array<i64: 256, 128>}, {pipeline_mode = #tpu.pipeline_mode<synchronous>, transform_indices = @transform_7, window_bounds = array<i64: 1, 128>}, {transform_indices = @transform_8, window_bounds = array<i64: 8, 128>}]} {
    %c0_i32 = arith.constant 0 : i32
    %0 = arith.cmpi eq, %arg1, %c0_i32 : i32
    %1 = arith.extui %0 : i1 to i32
    %c0_i32_0 = arith.constant 0 : i32
    %2 = arith.cmpi ne, %1, %c0_i32_0 : i32
    scf.if %2 {
      %cst_9 = arith.constant 0.000000e+00 : f32
      %12 = vector.broadcast %cst_9 : f32 to vector<8x768xf32>
      %c0_10 = arith.constant 0 : index
      %c0_11 = arith.constant 0 : index
      %13 = vector.load %arg11[%c0_10, %c0_11] : memref<8x768xf32, #tpu.memory_space<vmem>>, vector<8x768xf32>
      tpu.vector_store %arg11[%c0_10, %c0_11], %12 {strides = array<i32>} : memref<8x768xf32, #tpu.memory_space<vmem>>, vector<8x768xf32>,
    } else {
    }
    %c0 = arith.constant 0 : index
    %c0_1 = arith.constant 0 : index
    %3 = vector.load %arg11[%c0, %c0_1] : memref<8x768xf32, #tpu.memory_space<vmem>>, vector<8x768xf32>
    %c0_2 = arith.constant 0 : index
    %c0_3 = arith.constant 0 : index
    %c0_4 = arith.constant 0 : index
    %4 = vector.load %arg2[%c0_2, %c0_3, %c0_4] : memref<8x8x768xbf16, #tpu.memory_space<vmem>>, vector<8x8x768xbf16>
    %5 = arith.extf %4 : vector<8x8x768xbf16> to vector<8x8x768xf32>
    %cst = arith.constant dense<0.000000e+00> : vector<8x768xf32>
    %6 = vector.multi_reduction <add>, %5, %cst [1] : vector<8x8x768xf32> to vector<8x768xf32>
    %7 = arith.addf %3, %6 : vector<8x768xf32>
    %c0_5 = arith.constant 0 : index
    %c0_6 = arith.constant 0 : index
    %8 = vector.load %arg11[%c0_5, %c0_6] : memref<8x768xf32, #tpu.memory_space<vmem>>, vector<8x768xf32>
    tpu.vector_store %arg11[%c0_5, %c0_6], %7 {strides = array<i32>} : memref<8x768xf32, #tpu.memory_space<vmem>>, vector<8x768xf32>,
    %c0_i32_7 = arith.constant 0 : i32
    %9 = arith.cmpi eq, %arg1, %c0_i32_7 : i32
    %10 = arith.extui %9 : i1 to i32
    %c0_i32_8 = arith.constant 0 : i32
    %11 = arith.cmpi ne, %10, %c0_i32_8 : i32
    scf.if %11 {
      %c0_9 = arith.constant 0 : index
      %c0_10 = arith.constant 0 : index
      %12 = vector.load %arg3[%c0_9, %c0_10] : memref<8x1xf32, #tpu.memory_space<vmem>>, vector<8x1xf32>
      %cst_11 = arith.constant 1.000000e+00 : f32
      %13 = vector.broadcast %cst_11 : f32 to vector<8x1xf32>
      %14 = arith.maximumf %12, %13 : vector<8x1xf32>
      %c0_12 = arith.constant 0 : index
      %c0_13 = arith.constant 0 : index
      %15 = vector.load %arg11[%c0_12, %c0_13] : memref<8x768xf32, #tpu.memory_space<vmem>>, vector<8x768xf32>
      %16 = vector.broadcast %14 : vector<8x1xf32> to vector<8x768xf32>
      %17 = arith.divf %15, %16 : vector<8x768xf32>
      %18 = arith.truncf %17 : vector<8x768xf32> to vector<8x768xbf16>
      %c0_14 = arith.constant 0 : index
      %c0_15 = arith.constant 0 : index
      %19 = vector.load %arg4[%c0_14, %c0_15] : memref<768x768xbf16, #tpu.memory_space<vmem>>, vector<768x768xbf16>
      %cst_16 = arith.constant dense<0.000000e+00> : vector<8x768xf32>
      %20 = tpu.matmul %18, %19, %cst_16 {dimension_numbers = #tpu.dot_dimension_numbers<[1], [0], [0], [1], [0, 0, 1, 1], [], []>} : vector<8x768xbf16>, vector<768x768xbf16>, vector<8x768xf32> -> vector<8x768xf32>
      %c0_17 = arith.constant 0 : index
      %c0_18 = arith.constant 0 : index
      %21 = vector.load %arg5[%c0_17, %c0_18] : memref<1x768xf32, #tpu.memory_space<vmem>>, vector<1x768xf32>
      %22 = vector.broadcast %21 : vector<1x768xf32> to vector<8x768xf32>
      %23 = arith.addf %20, %22 : vector<8x768xf32>
      %24 = math.tanh %23 : vector<8x768xf32>
      %25 = arith.truncf %24 : vector<8x768xf32> to vector<8x768xbf16>
      %c0_19 = arith.constant 0 : index
      %c0_20 = arith.constant 0 : index
      %26 = vector.load %arg6[%c0_19, %c0_20] : memref<768x256xbf16, #tpu.memory_space<vmem>>, vector<768x256xbf16>
      %cst_21 = arith.constant dense<0.000000e+00> : vector<8x256xf32>
      %27 = tpu.matmul %25, %26, %cst_21 {dimension_numbers = #tpu.dot_dimension_numbers<[1], [0], [0], [1], [0, 0, 1, 1], [], []>} : vector<8x768xbf16>, vector<768x256xbf16>, vector<8x256xf32> -> vector<8x256xf32>
      %c0_22 = arith.constant 0 : index
      %c0_23 = arith.constant 0 : index
      %28 = vector.load %arg7[%c0_22, %c0_23] : memref<1x256xf32, #tpu.memory_space<vmem>>, vector<1x256xf32>
      %29 = vector.broadcast %28 : vector<1x256xf32> to vector<8x256xf32>
      %30 = arith.addf %27, %29 : vector<8x256xf32>
      %cst_24 = arith.constant 0.000000e+00 : f32
      %31 = vector.broadcast %cst_24 : f32 to vector<8x256xf32>
      %32 = arith.maximumf %30, %31 : vector<8x256xf32>
      %33 = arith.truncf %32 : vector<8x256xf32> to vector<8x256xbf16>
      %c0_25 = arith.constant 0 : index
      %c0_26 = arith.constant 0 : index
      %34 = vector.load %arg8[%c0_25, %c0_26] : memref<256x128xbf16, #tpu.memory_space<vmem>>, vector<256x128xbf16>
      %cst_27 = arith.constant dense<0.000000e+00> : vector<8x128xf32>
      %35 = tpu.matmul %33, %34, %cst_27 {dimension_numbers = #tpu.dot_dimension_numbers<[1], [0], [0], [1], [0, 0, 1, 1], [], []>} : vector<8x256xbf16>, vector<256x128xbf16>, vector<8x128xf32> -> vector<8x128xf32>
      %c0_28 = arith.constant 0 : index
      %c0_29 = arith.constant 0 : index
      %36 = vector.load %arg9[%c0_28, %c0_29] : memref<1x128xf32, #tpu.memory_space<vmem>>, vector<1x128xf32>
      %37 = vector.broadcast %36 : vector<1x128xf32> to vector<8x128xf32>
      %38 = arith.addf %35, %37 : vector<8x128xf32>
      %c0_30 = arith.constant 0 : index
      %c0_31 = arith.constant 0 : index
      %39 = vector.load %arg10[%c0_30, %c0_31] : memref<8x128xf32, #tpu.memory_space<vmem>>, vector<8x128xf32>
      tpu.vector_store %arg10[%c0_30, %c0_31], %38 {strides = array<i32>} : memref<8x128xf32, #tpu.memory_space<vmem>>, vector<8x128xf32>,
    } else {
    }
    return
  }
  func.func @transform_0(%arg0: i32, %arg1: i32) -> (i32, i32, i32) {
    %c0_i32 = arith.constant 0 : i32
    %c0_i32_0 = arith.constant 0 : i32
    return %arg0, %arg1, %c0_i32 : i32, i32, i32
  }
  func.func @transform_1(%arg0: i32, %arg1: i32) -> (i32, i32) {
    %c0_i32 = arith.constant 0 : i32
    %c0_i32_0 = arith.constant 0 : i32
    return %arg0, %c0_i32 : i32, i32
  }
  func.func @transform_2(%arg0: i32, %arg1: i32) -> (i32, i32) {
    %c0_i32 = arith.constant 0 : i32
    %c0_i32_0 = arith.constant 0 : i32
    %c0_i32_1 = arith.constant 0 : i32
    return %c0_i32, %c0_i32_0 : i32, i32
  }
  func.func @transform_3(%arg0: i32, %arg1: i32) -> (i32, i32) {
    %c0_i32 = arith.constant 0 : i32
    %c0_i32_0 = arith.constant 0 : i32
    %c0_i32_1 = arith.constant 0 : i32
    return %c0_i32, %c0_i32_0 : i32, i32
  }
  func.func @transform_4(%arg0: i32, %arg1: i32) -> (i32, i32) {
    %c0_i32 = arith.constant 0 : i32
    %c0_i32_0 = arith.constant 0 : i32
    %c0_i32_1 = arith.constant 0 : i32
    return %c0_i32, %c0_i32_0 : i32, i32
  }
  func.func @transform_5(%arg0: i32, %arg1: i32) -> (i32, i32) {
    %c0_i32 = arith.constant 0 : i32
    %c0_i32_0 = arith.constant 0 : i32
    %c0_i32_1 = arith.constant 0 : i32
    return %c0_i32, %c0_i32_0 : i32, i32
  }
  func.func @transform_6(%arg0: i32, %arg1: i32) -> (i32, i32) {
    %c0_i32 = arith.constant 0 : i32
    %c0_i32_0 = arith.constant 0 : i32
    %c0_i32_1 = arith.constant 0 : i32
    return %c0_i32, %c0_i32_0 : i32, i32
  }
  func.func @transform_7(%arg0: i32, %arg1: i32) -> (i32, i32) {
    %c0_i32 = arith.constant 0 : i32
    %c0_i32_0 = arith.constant 0 : i32
    %c0_i32_1 = arith.constant 0 : i32
    return %c0_i32, %c0_i32_0 : i32, i32
  }
  func.func @transform_8(%arg0: i32, %arg1: i32) -> (i32, i32) {
    %c0_i32 = arith.constant 0 : i32
    %c0_i32_0 = arith.constant 0 : i32
    return %arg0, %c0_i32 : i32, i32
  }
}

</mosaic_0001>

<bundles_post_ra>
// kernel: tpu_custom_call.1
= control target key start
LH: loop header
LB: loop body
LE: loop exit
PB: predicated region body
PF: predicated region fallthrough
CT: control target
= control target key end

     0   :  { %13 = vsyncpa [#allocation4], 0  ;;  %s5368_s0 = inlined_call_operand.hbm [shape: bf16[8,8,768], index: 0, kind: input, shape index: {}]   ;;  %s5369_s1 = inlined_call_operand.vmem [shape: f32[8,1], index: 1, kind: input, shape index: {}]   ;;  %s5370_s2 = inlined_call_operand.hbm [shape: bf16[768,768], index: 2, kind: input, shape index: {}]   ;;  %s5371_s3 = inlined_call_operand.hbm [shape: f32[1,768], index: 3, kind: input, shape index: {}]   ;;  %s5372_s4 = inlined_call_operand.hbm [shape: bf16[768,256], index: 4, kind: input, shape index: {}]   ;;  %s5373_s5 = inlined_call_operand.hbm [shape: f32[1,256], index: 5, kind: input, shape index: {}]   ;;  %s5374_s6 = inlined_call_operand.hbm [shape: bf16[256,128], index: 6, kind: input, shape index: {}]   ;;  %s5375_s7 = inlined_call_operand.hbm [shape: f32[1,128], index: 7, kind: input, shape index: {}]   ;;  %s5376_s8 = inlined_call_operand.hbm [shape: f32[8,128], index: 8, kind: output, shape index: {}]  }
   0x1   :  { %14 = vsyncpa [#allocation7], 0 }
   0x2   :  { %15 = vsyncpa [#allocation10], 0 }
   0x3   :  { %16 = vsyncpa [#allocation13], 0 }
   0x4   :  { %17 = vsyncpa [#allocation5], 0  ;;  %s4961_s27 = smov [#allocation6]   ;;  %s4962_s29 = smov [#allocation9]  }
   0x5   :  { %s37_s28 = sshll.u32 %s4961_s27, 4  ;;  %s59_s30 = sshll.u32 %s4962_s29, 4  ;;  %s38_s28 = int_to_ptr.vmem [resolvable:$true] %s37_s28  ;;  %s5021_s30 = int_to_ptr.vmem [resolvable:$true] %s59_s30 }
   0x6   :  { %s4775_s11 = scalar_lea.hbm %s5370_s2, 36864 }
   0x7   :  { %p4776_p0 = scmp.ne.s32.totalorder %s5370_s2, %s4775_s11  ;;  %p4779_p1 = scmp.lt.u32.totalorder %s4775_s11, %s5370_s2 }
   0x9   :  { %p4781_p2 = pnand %p4779_p1, %p4776_p0 }
   0xb   :  { %4784 = shalt.err (!%p4781_p2)
}
   0xc   :  { %s4785_s16 = scalar_lea.vmem %s38_s28, 36864  ;;  %p4790_p4 = scmp.lt.s32.totalorder %s38_s28, %s38_s28 }
   0xd   :  { %p4786_p3 = scmp.ne.s32.totalorder %s38_s28, %s4785_s16  ;;  %p4791_p5 = scmp.lt.s32.totalorder %s4785_s16, %s4785_s16 }
   0xf   :  { %p4792_p6 = por %p4791_p5, %p4790_p4 }
  0x11   :  { %p4793_p7 = pnand %p4792_p6, %p4786_p3 }
  0x13   :  { %4796 = shalt.err (!%p4793_p7)
}
  0x14   :  { %s4963_s17 = smov 384   ;;  %s4964_s18 = smov 24  }
  0x15   :  { %43 = dma.hbm_to_vmem [thread:$0]  %s5370_s2, 36864, %s38_s28, [#allocation7], %s4963_s17, %s4963_s17, %s4964_s18  }
  0x16   :  { %s4797_s23 = scalar_lea.hbm %s5372_s4, 12288 }
  0x17   :  { %p4798_p8 = scmp.ne.s32.totalorder %s5372_s4, %s4797_s23  ;;  %p4801_p9 = scmp.lt.u32.totalorder %s4797_s23, %s5372_s4 }
  0x19   :  { %p4803_p10 = pnand %p4801_p9, %p4798_p8 }
  0x1b   :  { %4806 = shalt.err (!%p4803_p10)
}
  0x1c   :  { %s4807_s29 = scalar_lea.vmem %s5021_s30, 12288  ;;  %p4812_p12 = scmp.lt.s32.totalorder %s5021_s30, %s5021_s30 }
  0x1d   :  { %p4808_p11 = scmp.ne.s32.totalorder %s5021_s30, %s4807_s29  ;;  %p4813_p13 = scmp.lt.s32.totalorder %s4807_s29, %s4807_s29 }
  0x1f   :  { %p4814_p0 = por %p4813_p13, %p4812_p12 }
  0x21   :  { %p4815_p1 = pnand %p4814_p0, %p4808_p11 }
  0x23   :  { %4818 = shalt.err (!%p4815_p1)
}
  0x24   :  { %s4965_s2 = smov 128   ;;  %s4966_s28 = smov 8  }
  0x25   :  { %65 = dma.hbm_to_vmem [thread:$0]  %s5372_s4, 12288, %s5021_s30, [#allocation10], %s4965_s2, %s4965_s2, %s4966_s28  }
  0x26   :  { %s4967_s11 = smov [#allocation12]   ;;  %s4819_s15 = scalar_lea.hbm %s5374_s6, 2048 }
  0x27   :  { %s81_s12 = sshll.u32 %s4967_s11, 4  ;;  %p4820_p2 = scmp.ne.s32.totalorder %s5374_s6, %s4819_s15  ;;  %s82_s12 = int_to_ptr.vmem [resolvable:$true] %s81_s12 }
  0x28   :  { %p4823_p3 = scmp.lt.u32.totalorder %s4819_s15, %s5374_s6 }
  0x2a   :  { %p4825_p4 = pnand %p4823_p3, %p4820_p2 }
  0x2c   :  { %4828 = shalt.err (!%p4825_p4)
}
  0x2d   :  { %s4829_s22 = scalar_lea.vmem %s82_s12, 2048  ;;  %p4834_p6 = scmp.lt.s32.totalorder %s82_s12, %s82_s12 }
  0x2e   :  { %p4830_p5 = scmp.ne.s32.totalorder %s82_s12, %s4829_s22  ;;  %p4835_p7 = scmp.lt.s32.totalorder %s4829_s22, %s4829_s22 }
  0x30   :  { %p4836_p8 = por %p4835_p7, %p4834_p6 }
  0x32   :  { %p4837_p9 = pnand %p4836_p8, %p4830_p5 }
  0x34   :  { %4840 = shalt.err (!%p4837_p9)
}
  0x35   :  { %s4968_s4 = smov 64   ;;  %s4969_s30 = smov 4  }
  0x36   :  { %87 = dma.hbm_to_vmem [thread:$0]  %s5374_s6, 2048, %s82_s12, [#allocation13], %s4968_s4, %s4968_s4, %s4969_s30  }
  0x37   :  { %s4970_s25 = smov [#allocation3]   ;;  %s4971_s27 = smov [#allocation8]  }
  0x38   :  { %s23_s26 = sshll.u32 %s4970_s25, 4  ;;  %s50_s29 = sshll.u32 %s4971_s27, 4  ;;  %s24_s26 = int_to_ptr.vmem [resolvable:$true] %s23_s26  ;;  %s51_s29 = int_to_ptr.vmem [resolvable:$true] %s50_s29 }
  0x39   :  { %s4841_s9 = scalar_lea.hbm %s5368_s0, 3072 }
  0x3a   :  { %p4842_p10 = scmp.ne.s32.totalorder %s5368_s0, %s4841_s9  ;;  %p4845_p11 = scmp.lt.u32.totalorder %s4841_s9, %s5368_s0 }
  0x3c   :  { %p4847_p12 = pnand %p4845_p11, %p4842_p10 }
  0x3e   :  { %4850 = shalt.err (!%p4847_p12)
}
  0x3f   :  { %s4851_s6 = scalar_lea.vmem %s24_s26, 3072  ;;  %p4856_p0 = scmp.lt.s32.totalorder %s24_s26, %s24_s26 }
  0x40   :  { %p4852_p13 = scmp.ne.s32.totalorder %s24_s26, %s4851_s6  ;;  %p4857_p1 = scmp.lt.s32.totalorder %s4851_s6, %s4851_s6 }
  0x42   :  { %p4858_p2 = por %p4857_p1, %p4856_p0 }
  0x44   :  { %p4859_p3 = pnand %p4858_p2, %p4852_p13 }
  0x46   :  { %4862 = shalt.err (!%p4859_p3)
}
  0x47   :  { %29 = dma.hbm_to_vmem [thread:$0]  %s5368_s0, 3072, %s24_s26, [#allocation4], %s4963_s17, %s4963_s17, %s4964_s18  }
  0x48   :  { %s4863_s20 = scalar_lea.hbm %s5371_s3, 96 }
  0x49   :  { %p4864_p4 = scmp.ne.s32.totalorder %s5371_s3, %s4863_s20  ;;  %p4867_p5 = scmp.lt.u32.totalorder %s4863_s20, %s5371_s3 }
  0x4b   :  { %p4869_p6 = pnand %p4867_p5, %p4864_p4 }
  0x4d   :  { %4872 = shalt.err (!%p4869_p6)
}
  0x4e   :  { %s4873_s23 = scalar_lea.vmem %s51_s29, 96  ;;  %p4878_p8 = scmp.lt.s32.totalorder %s51_s29, %s51_s29 }
  0x4f   :  { %p4874_p7 = scmp.ne.s32.totalorder %s51_s29, %s4873_s23  ;;  %p4879_p9 = scmp.lt.s32.totalorder %s4873_s23, %s4873_s23 }
  0x51   :  { %p4880_p10 = por %p4879_p9, %p4878_p8 }
  0x53   :  { %p4881_p11 = pnand %p4880_p10, %p4874_p7 }
  0x55   :  { %4884 = shalt.err (!%p4881_p11)
}
  0x56   :  { %53 = dma.hbm_to_vmem [thread:$0]  %s5371_s3, 96, %s51_s29, [#allocation7]  }
  0x57   :  { %s4972_s18 = smov [#allocation11]   ;;  %s4973_s25 = smov [#allocation14]  }
  0x58   :  { %s72_s24 = sshll.u32 %s4972_s18, 4  ;;  %s94_s26 = sshll.u32 %s4973_s25, 4  ;;  %s73_s24 = int_to_ptr.vmem [resolvable:$true] %s72_s24  ;;  %s95_s26 = int_to_ptr.vmem [resolvable:$true] %s94_s26 }
  0x59   :  { %s4885_s28 = scalar_lea.hbm %s5373_s5, 32 }
  0x5a   :  { %p4886_p12 = scmp.ne.s32.totalorder %s5373_s5, %s4885_s28  ;;  %p4889_p13 = scmp.lt.u32.totalorder %s4885_s28, %s5373_s5 }
  0x5c   :  { %p4891_p0 = pnand %p4889_p13, %p4886_p12 }
  0x5e   :  { %4894 = shalt.err (!%p4891_p0)
}
  0x5f   :  { %s4895_s3 = scalar_lea.vmem %s73_s24, 32  ;;  %p4900_p2 = scmp.lt.s32.totalorder %s73_s24, %s73_s24 }
  0x60   :  { %p4896_p1 = scmp.ne.s32.totalorder %s73_s24, %s4895_s3  ;;  %p4901_p3 = scmp.lt.s32.totalorder %s4895_s3, %s4895_s3 }
  0x62   :  { %p4902_p4 = por %p4901_p3, %p4900_p2 }
  0x64   :  { %p4903_p5 = pnand %p4902_p4, %p4896_p1 }
  0x66   :  { %4906 = shalt.err (!%p4903_p5)
}
  0x67   :  { %75 = dma.hbm_to_vmem [thread:$0]  %s5373_s5, 32, %s73_s24, [#allocation10]  }
  0x68   :  { %s4907_s15 = scalar_lea.hbm %s5375_s7, 16 }
  0x69   :  { %p4908_p6 = scmp.ne.s32.totalorder %s5375_s7, %s4907_s15  ;;  %p4911_p7 = scmp.lt.u32.totalorder %s4907_s15, %s5375_s7 }
  0x6b   :  { %p4913_p8 = pnand %p4911_p7, %p4908_p6 }
  0x6d   :  { %4916 = shalt.err (!%p4913_p8)
}
  0x6e   :  { %s4917_s22 = scalar_lea.vmem %s95_s26, 16  ;;  %s4921_s4 = scalar_lea.vmem %s95_s26, 32 }
  0x6f   :  { %p4918_p9 = scmp.ne.s32.totalorder %s95_s26, %s4917_s22  ;;  %p4922_p10 = scmp.lt.s32.totalorder %s95_s26, %s95_s26 }
  0x70   :  { %p4923_p11 = scmp.lt.s32.totalorder %s4921_s4, %s4917_s22 }
  0x72   :  { %p4924_p12 = por %p4923_p11, %p4922_p10 }
  0x74   :  { %p4925_p13 = pnand %p4924_p12, %p4918_p9 }
  0x76   :  { %4928 = shalt.err (!%p4925_p13)
}
  0x77   :  { %97 = dma.hbm_to_vmem [thread:$0]  %s5375_s7, 16, %s95_s26, [#allocation13]  }
  0x78   :  { %4951 = dma.done.wait [#allocation4], 3072  }
  0x79   :  { %4952 = vsyncadd [#allocation4], 4294964224 }
  0x7a   :  { %4953 = dma.done.wait [#allocation7], 36960  }
  0x7b   :  { %4954 = vsyncadd [#allocation7], 4294930336 }
  0x7c   :  { %4955 = dma.done.wait [#allocation10], 12320  }
  0x7d   :  { %4956 = vsyncadd [#allocation10], 4294954976 }
  0x7e   :  { %4957 = dma.done.wait [#allocation13], 2064  }
  0x7f   :  { %4958 = vsyncadd [#allocation13], 4294965232  ;;  %v4974_v0 = vmov 0   ;;  %v614_v1 = vld [vmem:[%s5369_s1] sm:$0xff]  ;;  %v4175_v7 = vld [vmem:[#allocation6 + $0x34] ss:$24 sps:$4 sm:$0xff]  }
  0x80   :  { %4168 = vset.pattern.permute.xlu0 %v4974_v0  ;;  %v615_v2 = vmax.f32 %v614_v1, 1.0  ;;  %v4169_v3 = vld [vmem:[#allocation6 + $0x4] ss:$24 sps:$4 sm:$0xff]   ;;  %v4173_v5 = vld [vmem:[#allocation6] ss:$24 sps:$4 sm:$0xff]   ;;  %vm544_vm0 = vcmask 1041409  }
  0x81   :  { %v4171_v4 = vld [vmem:[#allocation6 + $0xc] ss:$24 sps:$4 sm:$0xff]   ;;  %v4174_v6 = vld [vmem:[#allocation6 + $0x8] ss:$24 sps:$4 sm:$0xff]   ;;  %2400 = vmatprep.subr.bf16.mxu0 %v4169_v3  ;;  %v4177_v8 = vld [vmem:[#allocation6 + $0x3c] ss:$24 sps:$4 sm:$0xff]  }
  0x82   :  { %624 = vperm.xlu0 %4168, %v615_v2   ;;  %2523 = vmatprep.subr.bf16.mxu1 %v4171_v4  ;;  %v4179_v9 = vld [vmem:[#allocation6 + $0x30] ss:$24 sps:$4 sm:$0xff]   ;;  %v4181_v11 = vld [vmem:[#allocation6 + $0x64] ss:$24 sps:$4 sm:$0xff]   ;;  %v4185_v13 = vld [vmem:[#allocation6 + $0x60] ss:$24 sps:$4 sm:$0xff]  }
  0x83   :  { %2401 = vmatpush1.bf16.msra.mxu0 %v4173_v5  ;;  %2524 = vmatpush1.bf16.msra.mxu1 %v4174_v6  ;;  %v4180_v10 = vld [vmem:[#allocation6 + $0x38] ss:$24 sps:$4 sm:$0xff]   ;;  %v4183_v12 = vld [vmem:[#allocation6 + $0x6c] ss:$24 sps:$4 sm:$0xff]   ;;  %v4186_v14 = vld [vmem:[#allocation6 + $0x68] ss:$24 sps:$4 sm:$0xff]  }
  0x84   :  { %2402 = vmatprep.subr.bf16.mxu0 %v4175_v7  ;;  %2525 = vmatprep.subr.bf16.mxu1 %v4177_v8  ;;  %v4187_v15 = vld [vmem:[#allocation6 + $0x94] ss:$24 sps:$4 sm:$0xff]   ;;  %v4191_v17 = vld [vmem:[#allocation6 + $0x90] ss:$24 sps:$4 sm:$0xff]   ;;  %v4193_v19 = vld [vmem:[#allocation6 + $0xc4] ss:$24 sps:$4 sm:$0xff]  }
  0x85   :  { %v4189_v16 = vld [vmem:[#allocation6 + $0x9c] ss:$24 sps:$4 sm:$0xff]   ;;  %v4192_v18 = vld [vmem:[#allocation6 + $0x98] ss:$24 sps:$4 sm:$0xff]   ;;  %v4195_v20 = vld [vmem:[#allocation6 + $0xcc] ss:$24 sps:$4 sm:$0xff]  }
  0x86   :  { %v4197_v21 = vld [vmem:[#allocation6 + $0xc0] ss:$24 sps:$4 sm:$0xff]   ;;  %v4199_v23 = vld [vmem:[#allocation6 + $0xf4] ss:$24 sps:$4 sm:$0xff]   ;;  %v4203_v25 = vld [vmem:[#allocation6 + $0xf0] ss:$24 sps:$4 sm:$0xff]  }
  0x87   :  { %2403 = vmatpush1.bf16.msra.mxu0 %v4179_v9  ;;  %2526 = vmatpush1.bf16.msra.mxu1 %v4180_v10  ;;  %v4198_v22 = vld [vmem:[#allocation6 + $0xc8] ss:$24 sps:$4 sm:$0xff]   ;;  %v4201_v24 = vld [vmem:[#allocation6 + $0xfc] ss:$24 sps:$4 sm:$0xff]   ;;  %v4204_v26 = vld [vmem:[#allocation6 + $0xf8] ss:$24 sps:$4 sm:$0xff]  }
  0x88   :  { %2404 = vmatprep.subr.bf16.mxu0 %v4181_v11  ;;  %2527 = vmatprep.subr.bf16.mxu1 %v4183_v12  ;;  %v4205_v27 = vld [vmem:[#allocation6 + $0x124] ss:$24 sps:$4 sm:$0xff]   ;;  %v4209_v29 = vld [vmem:[#allocation6 + $0x120] ss:$24 sps:$4 sm:$0xff]   ;;  %v4211_v31 = vld [vmem:[#allocation6 + $0x154] ss:$24 sps:$4 sm:$0xff]  }
  0x89   :  { %v4207_v28 = vld [vmem:[#allocation6 + $0x12c] ss:$24 sps:$4 sm:$0xff]   ;;  %v4210_v30 = vld [vmem:[#allocation6 + $0x128] ss:$24 sps:$4 sm:$0xff]   ;;  %v4213_v32 = vld [vmem:[#allocation6 + $0x15c] ss:$24 sps:$4 sm:$0xff]  }
  0x8a   :  { %v4215_v33 = vld [vmem:[#allocation6 + $0x150] ss:$24 sps:$4 sm:$0xff]   ;;  %v4217_v35 = vld [vmem:[#allocation6 + $0x184] ss:$24 sps:$4 sm:$0xff]   ;;  %v4221_v37 = vld [vmem:[#allocation6 + $0x180] ss:$24 sps:$4 sm:$0xff]  }
  0x8b   :  { %2405 = vmatpush1.bf16.msra.mxu0 %v4185_v13  ;;  %2528 = vmatpush1.bf16.msra.mxu1 %v4186_v14  ;;  %v4216_v34 = vld [vmem:[#allocation6 + $0x158] ss:$24 sps:$4 sm:$0xff]   ;;  %v4219_v36 = vld [vmem:[#allocation6 + $0x18c] ss:$24 sps:$4 sm:$0xff]   ;;  %v4222_v38 = vld [vmem:[#allocation6 + $0x188] ss:$24 sps:$4 sm:$0xff]  }
  0x8c   :  { %2406 = vmatprep.subr.bf16.mxu0 %v4187_v15  ;;  %2529 = vmatprep.subr.bf16.mxu1 %v4189_v16  ;;  %v4223_v39 = vld [vmem:[#allocation6 + $0x1b4] ss:$24 sps:$4 sm:$0xff]   ;;  %v4227_v41 = vld [vmem:[#allocation6 + $0x1b0] ss:$24 sps:$4 sm:$0xff]   ;;  %v4229_v43 = vld [vmem:[#allocation6 + $0x1e4] ss:$24 sps:$4 sm:$0xff]  }
  0x8d   :  { %v4225_v40 = vld [vmem:[#allocation6 + $0x1bc] ss:$24 sps:$4 sm:$0xff]   ;;  %v4228_v42 = vld [vmem:[#allocation6 + $0x1b8] ss:$24 sps:$4 sm:$0xff]   ;;  %v4231_v44 = vld [vmem:[#allocation6 + $0x1ec] ss:$24 sps:$4 sm:$0xff]  }
  0x8e   :  { %v4233_v45 = vld [vmem:[#allocation6 + $0x1e0] ss:$24 sps:$4 sm:$0xff]   ;;  %v4235_v47 = vld [vmem:[#allocation6 + $0x214] ss:$24 sps:$4 sm:$0xff]   ;;  %v4239_v49 = vld [vmem:[#allocation6 + $0x210] ss:$24 sps:$4 sm:$0xff]  }
  0x8f   :  { %2407 = vmatpush1.bf16.msra.mxu0 %v4191_v17  ;;  %2530 = vmatpush1.bf16.msra.mxu1 %v4192_v18  ;;  %v4234_v46 = vld [vmem:[#allocation6 + $0x1e8] ss:$24 sps:$4 sm:$0xff]   ;;  %v4237_v48 = vld [vmem:[#allocation6 + $0x21c] ss:$24 sps:$4 sm:$0xff]   ;;  %v4240_v50 = vld [vmem:[#allocation6 + $0x218] ss:$24 sps:$4 sm:$0xff]  }
  0x90   :  { %2408 = vmatprep.subr.bf16.mxu0 %v4193_v19  ;;  %2531 = vmatprep.subr.bf16.mxu1 %v4195_v20  ;;  %v4241_v51 = vld [vmem:[#allocation6 + $0x244] ss:$24 sps:$4 sm:$0xff]   ;;  %v4245_v53 = vld [vmem:[#allocation6 + $0x240] ss:$24 sps:$4 sm:$0xff]   ;;  %v4247_v55 = vld [vmem:[#allocation6 + $0x274] ss:$24 sps:$4 sm:$0xff]  }
  0x91   :  { %v4243_v52 = vld [vmem:[#allocation6 + $0x24c] ss:$24 sps:$4 sm:$0xff]   ;;  %v4246_v54 = vld [vmem:[#allocation6 + $0x248] ss:$24 sps:$4 sm:$0xff]   ;;  %v4249_v56 = vld [vmem:[#allocation6 + $0x27c] ss:$24 sps:$4 sm:$0xff]  }
  0x92   :  { %v4251_v57 = vld [vmem:[#allocation6 + $0x270] ss:$24 sps:$4 sm:$0xff]   ;;  %v4253_v59 = vld [vmem:[#allocation6 + $0x2a4] ss:$24 sps:$4 sm:$0xff]   ;;  %v4257_v61 = vld [vmem:[#allocation6 + $0x2a0] ss:$24 sps:$4 sm:$0xff]  }
  0x93   :  { %2409 = vmatpush1.bf16.msra.mxu0 %v4197_v21  ;;  %2532 = vmatpush1.bf16.msra.mxu1 %v4198_v22  ;;  %v4252_v58 = vld [vmem:[#allocation6 + $0x278] ss:$24 sps:$4 sm:$0xff]   ;;  %v4255_v60 = vld [vmem:[#allocation6 + $0x2ac] ss:$24 sps:$4 sm:$0xff]   ;;  %v4258_v62 = vld [vmem:[#allocation6 + $0x2a8] ss:$24 sps:$4 sm:$0xff]  }
  0x94   :  { %2410 = vmatprep.subr.bf16.mxu0 %v4199_v23  ;;  %2533 = vmatprep.subr.bf16.mxu1 %v4201_v24  ;;  %v4259_v63 = vld [vmem:[#allocation6 + $0x2d4] ss:$24 sps:$4 sm:$0xff]   ;;  %v4263_v1 = vld [vmem:[#allocation6 + $0x2d0] ss:$24 sps:$4 sm:$0xff]   ;;  %v4267_v3 = vld [vmem:[#allocation6 + $0x304] ss:$24 sps:$4 sm:$0xff]  }
  0x95   :  { %v4261_v0 = vld [vmem:[#allocation6 + $0x2dc] ss:$24 sps:$4 sm:$0xff]   ;;  %v4264_v2 = vld [vmem:[#allocation6 + $0x2d8] ss:$24 sps:$4 sm:$0xff]   ;;  %v4270_v4 = vld [vmem:[#allocation6 + $0x30c] ss:$24 sps:$4 sm:$0xff]  }
  0x96   :  { %v5121_v5 = vld [vmem:[#allocation3] sm:$0xff]  ;;  %v5123_v6 = vld [vmem:[#allocation3 + $0x18] sm:$0xff]  ;;  %v5125_v7 = vld [vmem:[#allocation3 + $0x30] sm:$0xff]  ;;  %vm546_vm1 = vcmask 1042434   ;;  %vm548_vm2 = vcmask 1043459   ;;  %vm550_vm3 = vcmask 1044484  }
  0x97   :  { %2411 = vmatpush1.bf16.msra.mxu0 %v4203_v25  ;;  %2534 = vmatpush1.bf16.msra.mxu1 %v4204_v26  ;;  %v5127_v8 = vld [vmem:[#allocation3 + $0x48] sm:$0xff]  ;;  %v5129_v9 = vld [vmem:[#allocation3 + $0x60] sm:$0xff]  ;;  %v161_v10 = vunpack.c.h.bf16 %v5121_v5  ;;  %v167_v11 = vunpack.c.h.bf16 %v5123_v6  ;;  %v5133_v12 = vld [vmem:[#allocation3 + $0x78] sm:$0xff]  ;;  %v173_v13 = vunpack.c.h.bf16 %v5125_v7  ;;  %vm552_vm4 = vcmask 1045509   ;;  %s4975_s1 = smov [#allocation15]  }
  0x98   :  { %2412 = vmatprep.subr.bf16.mxu0 %v4205_v27  ;;  %2535 = vmatprep.subr.bf16.mxu1 %v4207_v28  ;;  %v5136_v14 = vld [vmem:[#allocation3 + $0x90] sm:$0xff]  ;;  %v179_v15 = vunpack.c.h.bf16 %v5127_v8  ;;  %v185_v16 = vunpack.c.h.bf16 %v5129_v9  ;;  %v5140_v17 = vld [vmem:[#allocation3 + $0xa8] sm:$0xff]  ;;  %v191_v20 = vunpack.c.h.bf16 %v5133_v12  ;;  %vm554_vm5 = vcmask 1046534   ;;  %s3678_s7 = sshll.u32 %s4975_s1, 4  ;;  %s3679_s7 = int_to_ptr.vmem [resolvable:$true] %s3678_s7 }
  0x99   :  { %v214_v18 = vrot.slane %v161_v10, 4  ;;  %v250_v19 = vrot.slane %v167_v11, 4  ;;  %v197_v21 = vunpack.c.h.bf16 %v5136_v14  ;;  %v286_v22 = vrot.slane %v173_v13, 4  ;;  %s4929_s17 = scalar_lea.vmem %s3679_s7, 128  ;;  %p4934_p1 = scmp.lt.s32.totalorder %s3679_s7, %s3679_s7 }
  0x9a   :  { %v203_v23 = vunpack.c.h.bf16 %v5140_v17  ;;  %v322_v24 = vrot.slane %v179_v15, 4  ;;  %v358_v25 = vrot.slane %v185_v16, 4  ;;  %v394_v28 = vrot.slane %v191_v20, 4  ;;  %p4930_p0 = scmp.ne.s32.totalorder %s3679_s7, %s4929_s17  ;;  %p4935_p2 = scmp.lt.s32.totalorder %s4929_s17, %s4929_s17 }
  0x9b   :  { %2413 = vmatpush1.bf16.msra.mxu0 %v4209_v29  ;;  %2536 = vmatpush1.bf16.msra.mxu1 %v4210_v30  ;;  %v215_v26 = vadd.f32 %v214_v18, %v161_v10  ;;  %v251_v27 = vadd.f32 %v250_v19, %v167_v11  ;;  %v287_v29 = vadd.f32 %v286_v22, %v173_v13  ;;  %v430_v30 = vrot.slane %v197_v21, 4 }
  0x9c   :  { %2414 = vmatprep.subr.bf16.mxu0 %v4211_v31  ;;  %2537 = vmatprep.subr.bf16.mxu1 %v4213_v32  ;;  %v323_v31 = vadd.f32 %v322_v24, %v179_v15  ;;  %v359_v32 = vadd.f32 %v358_v25, %v185_v16  ;;  %v184_v15 = vunpack.c.l.bf16 %v5129_v9  ;;  %vm556_vm6 = vcmask 1047559   ;;  %p4936_p3 = por %p4935_p2, %p4934_p1 }
  0x9e   :  { %p4937_p4 = pnand %p4936_p3, %p4930_p0 }
  0x9f   :  { %2415 = vmatpush1.bf16.msra.mxu0 %v4215_v33  ;;  %2538 = vmatpush1.bf16.msra.mxu1 %v4216_v34  ;;  %v466_v33 = vrot.slane %v203_v23, 4  ;;  %v5145_v34 = vld [vmem:[#allocation3 + $0x8] sm:$0xff] }
  0xa0   :  { %2416 = vmatprep.subr.bf16.mxu0 %v4217_v35  ;;  %2539 = vmatprep.subr.bf16.mxu1 %v4219_v36  ;;  %v5147_v35 = vld [vmem:[#allocation3 + $0x20] sm:$0xff]  ;;  %v216_v36 = vrot.slane %v215_v26, 2 }
  0xa3   :  { %2417 = vmatpush1.bf16.msra.mxu0 %v4221_v37  ;;  %2540 = vmatpush1.bf16.msra.mxu1 %v4222_v38  ;;  %v252_v37 = vrot.slane %v251_v27, 2  ;;  %v395_v38 = vadd.f32 %v394_v28, %v191_v20 }
  0xa4   :  { %2418 = vmatprep.subr.bf16.mxu0 %v4223_v39  ;;  %2541 = vmatprep.subr.bf16.mxu1 %v4225_v40  ;;  %v160_v39 = vunpack.c.l.bf16 %v5121_v5  ;;  %v166_v40 = vunpack.c.l.bf16 %v5123_v6 }
  0xa7   :  { %2419 = vmatpush1.bf16.msra.mxu0 %v4227_v41  ;;  %2542 = vmatpush1.bf16.msra.mxu1 %v4228_v42  ;;  %v288_v41 = vrot.slane %v287_v29, 2  ;;  %v431_v42 = vadd.f32 %v430_v30, %v197_v21  ;;  %v5176_v21 = vld [vmem:[#allocation3 + $0x80] sm:$0xff]  ;;  %v352_v30 = vrot.slane %v184_v15, 4 }
  0xa8   :  { %2420 = vmatprep.subr.bf16.mxu0 %v4229_v43  ;;  %2543 = vmatprep.subr.bf16.mxu1 %v4231_v44  ;;  %v5151_v43 = vld [vmem:[#allocation3 + $0x38] sm:$0xff]  ;;  %v163_v44 = vunpack.c.h.bf16 %v5145_v34 }
  0xab   :  { %2421 = vmatpush1.bf16.msra.mxu0 %v4233_v45  ;;  %2544 = vmatpush1.bf16.msra.mxu1 %v4234_v46  ;;  %v169_v45 = vunpack.c.h.bf16 %v5147_v35  ;;  %v324_v46 = vrot.slane %v323_v31, 2 }
  0xac   :  { %2422 = vmatprep.subr.bf16.mxu0 %v4235_v47  ;;  %2545 = vmatprep.subr.bf16.mxu1 %v4237_v48  ;;  %v360_v47 = vrot.slane %v359_v32, 2  ;;  %v5155_v48 = vadd.f32 %v466_v33, %v203_v23 }
  0xaf   :  { %2423 = vmatpush1.bf16.msra.mxu0 %v4239_v49  ;;  %2546 = vmatpush1.bf16.msra.mxu1 %v4240_v50  ;;  %v217_v49 = vadd.f32 %v216_v36, %v215_v26  ;;  %v253_v50 = vadd.f32 %v252_v37, %v251_v27 }
  0xb0   :  { %2424 = vmatprep.subr.bf16.mxu0 %v4241_v51  ;;  %2547 = vmatprep.subr.bf16.mxu1 %v4243_v52  ;;  %v172_v51 = vunpack.c.l.bf16 %v5125_v7  ;;  %v396_v52 = vrot.slane %v395_v38, 2 }
  0xb2   :  { %v5170_v6 = vadd.f32 %v396_v52, %v395_v38  ;;  %v353_v52 = vadd.f32 %v352_v30, %v184_v15 }
  0xb3   :  { %2425 = vmatpush1.bf16.msra.mxu0 %v4245_v53  ;;  %2548 = vmatpush1.bf16.msra.mxu1 %v4246_v54  ;;  %v208_v53 = vrot.slane %v160_v39, 4  ;;  %v244_v54 = vrot.slane %v166_v40, 4 }
  0xb4   :  { %2426 = vmatprep.subr.bf16.mxu0 %v4247_v55  ;;  %2549 = vmatprep.subr.bf16.mxu1 %v4249_v56  ;;  %v5158_v55 = vld [vmem:[#allocation3 + $0x50] sm:$0xff]  ;;  %v175_v56 = vunpack.c.h.bf16 %v5151_v43 }
  0xb5   :  { %v181_v5 = vunpack.c.h.bf16 %v5158_v55  ;;  %v209_v7 = vadd.f32 %v208_v53, %v160_v39  ;;  %v245_v10 = vadd.f32 %v244_v54, %v166_v40 }
  0xb6   :  { %v298_v11 = vrot.slane %v175_v56, 4 }
  0xb7   :  { %2427 = vmatpush1.bf16.msra.mxu0 %v4251_v57  ;;  %2550 = vmatpush1.bf16.msra.mxu1 %v4252_v58  ;;  %v289_v57 = vadd.f32 %v288_v41, %v287_v29  ;;  %v432_v58 = vrot.slane %v431_v42, 2  ;;  %v334_v26 = vrot.slane %v181_v5, 4  ;;  %v210_v28 = vrot.slane %v209_v7, 2 }
  0xb8   :  { %2428 = vmatprep.subr.bf16.mxu0 %v4253_v59  ;;  %2551 = vmatprep.subr.bf16.mxu1 %v4255_v60  ;;  %v226_v59 = vrot.slane %v163_v44, 4  ;;  %v262_v60 = vrot.slane %v169_v45, 4  ;;  %v246_v9 = vrot.slane %v245_v10, 2  ;;  %v299_v29 = vadd.f32 %v298_v11, %v175_v56 }
  0xb9   :  { %v5172_v13 = vadd.f32 %v432_v58, %v431_v42  ;;  %v290_v19 = vrot.slane %v289_v57, 1  ;;  %v196_v41 = vunpack.c.l.bf16 %v5136_v14  ;;  %v202_v56 = vunpack.c.l.bf16 %v5140_v17 }
  0xba   :  { %v227_v16 = vadd.f32 %v226_v59, %v163_v44  ;;  %v263_v18 = vadd.f32 %v262_v60, %v169_v45  ;;  %v335_v44 = vadd.f32 %v334_v26, %v181_v5  ;;  %v211_v45 = vadd.f32 %v210_v28, %v209_v7 }
  0xbb   :  { %2429 = vmatpush1.bf16.msra.mxu0 %v4257_v61  ;;  %2552 = vmatpush1.bf16.msra.mxu1 %v4258_v62  ;;  %v5161_v61 = vadd.f32 %v324_v46, %v323_v31  ;;  %v5163_v62 = vadd.f32 %v360_v47, %v359_v32  ;;  %v5183_v31 = vld [vmem:[#allocation3 + $0x98] sm:$0xff]  ;;  %v5186_v40 = vadd.f32 %v290_v19, %v289_v57  ;;  %v5189_v47 = vld [vmem:[#allocation3 + $0xb0] sm:$0xff]  ;;  %v424_v60 = vrot.slane %v196_v41, 4 }
  0xbc   :  { %2430 = vmatprep.subr.bf16.mxu0 %v4259_v63  ;;  %2553 = vmatprep.subr.bf16.mxu1 %v4261_v0  ;;  %v468_v63 = vrot.slane %v5155_v48, 2  ;;  %v178_v0 = vunpack.c.l.bf16 %v5127_v8  ;;  %v190_v8 = vunpack.c.l.bf16 %v5133_v12  ;;  %v193_v12 = vunpack.c.h.bf16 %v5176_v21 }
  0xbd   :  { %v326_v23 = vrot.slane %v5161_v61, 1  ;;  %v362_v24 = vrot.slane %v5163_v62, 1  ;;  %v228_v32 = vrot.slane %v227_v16, 2  ;;  %v264_v33 = vrot.slane %v263_v18, 2 }
  0xbe   :  { %v316_v20 = vrot.slane %v178_v0, 4  ;;  %v388_v38 = vrot.slane %v190_v8, 4  ;;  %v247_v46 = vadd.f32 %v246_v9, %v245_v10  ;;  %v406_v54 = vrot.slane %v193_v12, 4 }
  0xbf   :  { %2431 = vmatpush1.bf16.msra.mxu0 %v4263_v1  ;;  %2554 = vmatpush1.bf16.msra.mxu1 %v4264_v2  ;;  %v218_v1 = vrot.slane %v217_v49, 1  ;;  %v254_v2 = vrot.slane %v253_v50, 1  ;;  %v229_v53 = vadd.f32 %v228_v32, %v227_v16  ;;  %v354_v10 = vrot.slane %v353_v52, 2 }
  0xc0   :  { %2441 = vmatprep.subr.bf16.mxu0 %v4267_v3  ;;  %2564 = vmatprep.subr.bf16.mxu1 %v4270_v4  ;;  %v280_v3 = vrot.slane %v172_v51, 4  ;;  %v5167_v4 = vld [vmem:[#allocation3 + $0x68] sm:$0xff]  ;;  %v317_v37 = vadd.f32 %v316_v20, %v178_v0  ;;  %v389_v58 = vadd.f32 %v388_v38, %v190_v8  ;;  %v205_v0 = vunpack.c.h.bf16 %v5189_v47 }
  0xc1   :  { %v187_v22 = vunpack.c.h.bf16 %v5167_v4  ;;  %v5181_v27 = vadd.f32 %v218_v1, %v217_v49  ;;  %v255_v36 = vadd.f32 %v254_v2, %v253_v50  ;;  %v199_v49 = vunpack.c.h.bf16 %v5183_v31 }
  0xc2   :  { %v281_v25 = vadd.f32 %v280_v3, %v172_v51  ;;  %v300_v51 = vrot.slane %v299_v29, 2  ;;  %v265_v50 = vadd.f32 %v264_v33, %v263_v18  ;;  %v318_v57 = vrot.slane %v317_v37, 2 }
  0xc3   :  { %v370_v39 = vrot.slane %v187_v22, 4  ;;  %v336_v1 = vrot.slane %v335_v44, 2  ;;  %v212_v2 = vrot.slane %v211_v45, 1  ;;  %v248_v3 = vrot.slane %v247_v46, 1 }
  0xc4   :  { %v282_v42 = vrot.slane %v281_v25, 2  ;;  %v301_v5 = vadd.f32 %v300_v51, %v299_v29  ;;  %v442_v7 = vrot.slane %v199_v49, 4  ;;  %v230_v11 = vrot.slane %v229_v53, 1 }
  0xc5   :  { %v371_v59 = vadd.f32 %v370_v39, %v187_v22  ;;  %v266_v15 = vrot.slane %v265_v50, 1  ;;  %v407_v16 = vadd.f32 %v406_v54, %v193_v12  ;;  %v319_v18 = vadd.f32 %v318_v57, %v317_v37 }
  0xc6   :  { %v283_v14 = vadd.f32 %v282_v42, %v281_v25  ;;  %v390_v19 = vrot.slane %v389_v58, 2  ;;  %v460_v17 = vrot.slane %v202_v56, 4  ;;  %v425_v22 = vadd.f32 %v424_v60, %v196_v41 }
  0xc7   :  { %v372_v20 = vrot.slane %v371_v59, 2  ;;  %v337_v25 = vadd.f32 %v336_v1, %v335_v44  ;;  %v478_v26 = vrot.slane %v205_v0, 4  ;;  %v213_v28 = vadd.f32 %v212_v2, %v211_v45 }
  0xc8   :  { %v284_v8 = vrot.slane %v283_v14, 1  ;;  %v249_v9 = vadd.f32 %v248_v3, %v247_v46  ;;  %v302_v30 = vrot.slane %v301_v5, 1  ;;  %v443_v32 = vadd.f32 %v442_v7, %v199_v49 }
  0xc9   :  { %v355_v33 = vadd.f32 %v354_v10, %v353_v52  ;;  %v231_v29 = vadd.f32 %v230_v11, %v229_v53  ;;  %v267_v38 = vadd.f32 %v266_v15, %v265_v50  ;;  %v408_v39 = vrot.slane %v407_v16, 2 }
  0xca   :  { %v558_v12 = vsel %vm544_vm0, %v255_v36, %v5181_v27  ;;  %v320_v37 = vrot.slane %v319_v18, 1  ;;  %v461_v42 = vadd.f32 %v460_v17, %v202_v56  ;;  %v373_v51 = vadd.f32 %v372_v20, %v371_v59 }
  0xcb   :  { %v285_v54 = vadd.f32 %v284_v8, %v283_v14  ;;  %v426_v57 = vrot.slane %v425_v22, 2  ;;  %v338_v41 = vrot.slane %v337_v25, 1  ;;  %v479_v44 = vadd.f32 %v478_v26, %v205_v0 }
  0xcc   :  { %v391_v60 = vadd.f32 %v390_v19, %v389_v58  ;;  %v545_v45 = vsel %vm544_vm0, %v249_v9, %v213_v28  ;;  %v303_v46 = vadd.f32 %v302_v30, %v301_v5  ;;  %v444_v49 = vrot.slane %v443_v32, 2 }
  0xcd   :  { %v327_v52 = vadd.f32 %v326_v23, %v5161_v61  ;;  %v356_v53 = vrot.slane %v355_v33, 1  ;;  %v409_v50 = vadd.f32 %v408_v39, %v407_v16  ;;  %v572_v27 = vsel %vm544_vm0, %v267_v38, %v231_v29 }
  0xce   :  { %v559_v36 = vsel %vm546_vm1, %v5186_v40, %v558_v12  ;;  %v321_v56 = vadd.f32 %v320_v37, %v319_v18  ;;  %v462_v59 = vrot.slane %v461_v42, 2  ;;  %v374_v14 = vrot.slane %v373_v51, 1 }
  0xcf   :  { %v427_v0 = vadd.f32 %v426_v57, %v425_v22  ;;  %v547_v58 = vsel %vm546_vm1, %v285_v54, %v545_v45  ;;  %v339_v1 = vadd.f32 %v338_v41, %v337_v25  ;;  %v480_v2 = vrot.slane %v479_v44, 2 }
  0xd0   :  { %v398_v3 = vrot.slane %v5170_v6, 1  ;;  %v392_v5 = vrot.slane %v391_v60, 1  ;;  %v445_v7 = vadd.f32 %v444_v49, %v443_v32  ;;  %v573_v61 = vsel %vm546_vm1, %v303_v46, %v572_v27 }
  0xd1   :  { %v363_v23 = vadd.f32 %v362_v24, %v5163_v62  ;;  %v469_v40 = vadd.f32 %v468_v63, %v5155_v48  ;;  %v357_v10 = vadd.f32 %v356_v53, %v355_v33  ;;  %v410_v11 = vrot.slane %v409_v50, 1  ;;  %v4265_v53 = vld [vmem:[#allocation6 + $0x300] ss:$24 sps:$4 sm:$0xff]  }
  0xd2   :  { %v560_v15 = vsel %vm548_vm2, %v327_v52, %v559_v36  ;;  %v463_v16 = vadd.f32 %v462_v59, %v461_v42  ;;  %v549_v18 = vsel %vm548_vm2, %v321_v56, %v547_v58  ;;  %v375_v19 = vadd.f32 %v374_v14, %v373_v51  ;;  %v4273_v59 = vld [vmem:[#allocation6 + $0x334] ss:$24 sps:$4 sm:$0xff]   ;;  %v4271_v58 = vld [vmem:[#allocation6 + $0x330] ss:$24 sps:$4 sm:$0xff]  }
  0xd3   :  { %v434_v17 = vrot.slane %v5172_v13, 1  ;;  %v428_v20 = vrot.slane %v427_v0, 1  ;;  %v481_v8 = vadd.f32 %v480_v2, %v479_v44  ;;  %v574_v22 = vsel %vm548_vm2, %v339_v1, %v573_v61  ;;  %v4276_v14 = vld [vmem:[#allocation6 + $0x33c] ss:$24 sps:$4 sm:$0xff]   ;;  %v4274_v1 = vld [vmem:[#allocation6 + $0x338] ss:$24 sps:$4 sm:$0xff]  }
  0xd4   :  { %v399_v62 = vadd.f32 %v398_v3, %v5170_v6  ;;  %v393_v24 = vadd.f32 %v392_v5, %v391_v60  ;;  %v446_v25 = vrot.slane %v445_v7, 1  ;;  %v561_v48 = vsel %vm550_vm3, %v363_v23, %v560_v15  ;;  %v4279_v2 = vld [vmem:[#allocation6 + $0x364] ss:$24 sps:$4 sm:$0xff]   ;;  %v4277_v5 = vld [vmem:[#allocation6 + $0x360] ss:$24 sps:$4 sm:$0xff]  }
  0xd5   :  { %v551_v63 = vsel %vm550_vm3, %v357_v10, %v549_v18  ;;  %v411_v28 = vadd.f32 %v410_v11, %v409_v50  ;;  %v470_v9 = vrot.slane %v469_v40, 1  ;;  %v464_v30 = vrot.slane %v463_v16, 1  ;;  %v4268_v50 = vld [vmem:[#allocation6 + $0x308] ss:$24 sps:$4 sm:$0xff]   ;;  %v4282_v3 = vld [vmem:[#allocation6 + $0x36c] ss:$24 sps:$4 sm:$0xff]  }
  0xd6   :  { %v575_v32 = vsel %vm550_vm3, %v375_v19, %v574_v22  ;;  %v435_v33 = vadd.f32 %v434_v17, %v5172_v13  ;;  %v429_v29 = vadd.f32 %v428_v20, %v427_v0  ;;  %v482_v38 = vrot.slane %v481_v8, 1  ;;  %v4285_v61 = vld [vmem:[#allocation6 + $0x394] ss:$24 sps:$4 sm:$0xff]   ;;  %v4283_v11 = vld [vmem:[#allocation6 + $0x390] ss:$24 sps:$4 sm:$0xff]   ;;  %v5253_v20 = vld [vmem:[#allocation3 + $0x40] sm:$0xff] }
  0xd7   :  { %v562_v6 = vsel %vm552_vm4, %v399_v62, %v561_v48  ;;  %v553_v39 = vsel %vm552_vm4, %v393_v24, %v551_v63  ;;  %v447_v12 = vadd.f32 %v446_v25, %v445_v7  ;;  %v576_v37 = vsel %vm552_vm4, %v411_v28, %v575_v32  ;;  %v4280_v7 = vld [vmem:[#allocation6 + $0x368] ss:$24 sps:$4 sm:$0xff]   ;;  %v4288_v23 = vld [vmem:[#allocation6 + $0x39c] ss:$24 sps:$4 sm:$0xff]   ;;  %v4286_v15 = vld [vmem:[#allocation6 + $0x398] ss:$24 sps:$4 sm:$0xff]  }
  0xd8   :  { %v471_v42 = vadd.f32 %v470_v9, %v469_v40  ;;  %v465_v51 = vadd.f32 %v464_v30, %v463_v16  ;;  %v563_v54 = vsel %vm554_vm5, %v435_v33, %v562_v6  ;;  %v555_v57 = vsel %vm554_vm5, %v429_v29, %v553_v39  ;;  %v5247_v40 = vld [vmem:[#allocation3 + $0x10] sm:$0xff]  ;;  %v5249_v10 = vld [vmem:[#allocation3 + $0x28] sm:$0xff]  ;;  %v4291_v16 = vld [vmem:[#allocation6 + $0x3c4] ss:$24 sps:$4 sm:$0xff]  }
  0xd9   :  { %v483_v41 = vadd.f32 %v482_v38, %v481_v8  ;;  %v577_v13 = vsel %vm554_vm5, %v447_v12, %v576_v37  ;;  %v162_v18 = vunpack.c.l.bf16 %v5145_v34  ;;  %v168_v19 = vunpack.c.l.bf16 %v5147_v35  ;;  %v4294_v17 = vld [vmem:[#allocation6 + $0x3cc] ss:$24 sps:$4 sm:$0xff]   ;;  %v4289_v62 = vld [vmem:[#allocation6 + $0x3c0] ss:$24 sps:$4 sm:$0xff]   ;;  %v4300_v34 = vld [vmem:[#allocation6 + $0x3fc] ss:$24 sps:$4 sm:$0xff]  }
  0xda   :  { %v564_v44 = vsel %vm556_vm6, %v471_v42, %v563_v54  ;;  %v557_v60 = vsel %vm556_vm6, %v465_v51, %v555_v57  ;;  %v165_v8 = vunpack.c.h.bf16 %v5247_v40  ;;  %v171_v22 = vunpack.c.h.bf16 %v5249_v10  ;;  %v4292_v24 = vld [vmem:[#allocation6 + $0x3c8] ss:$24 sps:$4 sm:$0xff]   ;;  %v5258_v63 = vld [vmem:[#allocation3 + $0x58] sm:$0xff]  ;;  %v5261_v9 = vld [vmem:[#allocation3 + $0x70] sm:$0xff] }
  0xdb   :  { %v578_v45 = vsel %vm556_vm6, %v483_v41, %v577_v13  ;;  %v174_v25 = vunpack.c.l.bf16 %v5151_v43  ;;  %v220_v35 = vrot.slane %v162_v18, 4  ;;  %v256_v48 = vrot.slane %v168_v19, 4  ;;  %v4295_v29 = vld [vmem:[#allocation6 + $0x3f0] ss:$24 sps:$4 sm:$0xff]   ;;  %v4303_v38 = vld [vmem:[#allocation6 + $0x424] ss:$24 sps:$4 sm:$0xff]  }
  0xdc   :  { %v177_v28 = vunpack.c.h.bf16 %v5253_v20  ;;  %v238_v30 = vrot.slane %v165_v8, 4  ;;  %v274_v32 = vrot.slane %v171_v22, 4  ;;  %v180_v33 = vunpack.c.l.bf16 %v5158_v55  ;;  %v4298_v43 = vld [vmem:[#allocation6 + $0x3f8] ss:$24 sps:$4 sm:$0xff]   ;;  %v4306_v12 = vld [vmem:[#allocation6 + $0x42c] ss:$24 sps:$4 sm:$0xff]  }
  0xdd   :  { %v292_v6 = vrot.slane %v174_v25, 4  ;;  %v183_v39 = vunpack.c.h.bf16 %v5258_v63  ;;  %v221_v37 = vadd.f32 %v220_v35, %v162_v18  ;;  %v257_v42 = vadd.f32 %v256_v48, %v168_v19  ;;  %v5265_v51 = vld [vmem:[#allocation3 + $0x88] sm:$0xff] }
  0xde   :  { %v310_v54 = vrot.slane %v177_v28, 4  ;;  %v186_v57 = vunpack.c.l.bf16 %v5167_v4  ;;  %v239_v41 = vadd.f32 %v238_v30, %v165_v8  ;;  %v275_v55 = vadd.f32 %v274_v32, %v171_v22  ;;  %v5270_v4 = vld [vmem:[#allocation3 + $0xa0] sm:$0xff] }
  0xdf   :  { %v192_v13 = vunpack.c.l.bf16 %v5176_v21  ;;  %v195_v21 = vunpack.c.h.bf16 %v5265_v51  ;;  %v4316_v30 = vld [vmem:[#allocation6 + $0x488] ss:$24 sps:$4 sm:$0xff]  }
  0xe1   :  { %v418_v48 = vrot.slane %v195_v21, 4 }
 0x101   :  { %v625_v26 = vpop.permute.xlu0 %624 }
 0x102   :  { %4761 = vrcp.f32 %v625_v26  ;;  %v4297_v26 = vld [vmem:[#allocation6 + $0x3f4] ss:$24 sps:$4 sm:$0xff]  }
 0x10c   :  { %v5230_v46 = vpop.eup %4761 }
 0x10d   :  { %v629_v49 = vmul.f32 %v5230_v46, %v564_v44  ;;  %v628_v52 = vmul.f32 %v5230_v46, %v557_v60  ;;  %v631_v27 = vmul.f32 %v5230_v46, %v578_v45  ;;  %v4301_v44 = vld [vmem:[#allocation6 + $0x420] ss:$24 sps:$4 sm:$0xff]   ;;  %v328_v45 = vrot.slane %v180_v33, 4 }
 0x10e   :  { %v4304_v60 = vld [vmem:[#allocation6 + $0x428] ss:$24 sps:$4 sm:$0xff]  }
 0x10f   :  { %v5235_v36 = vpack.c.bf16 %v629_v49, %v629_v49  ;;  %v5237_v56 = vpack.c.bf16 %v628_v52, %v628_v52  ;;  %v5243_v0 = vpack.c.bf16 %v631_v27, %v631_v27  ;;  %v189_v49 = vunpack.c.h.bf16 %v5261_v9  ;;  %v4309_v52 = vld [vmem:[#allocation6 + $0x454] ss:$24 sps:$4 sm:$0xff]  }
 0x110   :  { %v4312_v27 = vld [vmem:[#allocation6 + $0x45c] ss:$24 sps:$4 sm:$0xff]  }
 0x111   :  { %2432 = vmatprep.mubr.bf16.mxu0 %v5235_v36  ;;  %2555 = vmatprep.mubr.bf16.mxu1 %v5235_v36 }
 0x112   :  { %2433 = vmatmul.mubr.bf16.vlgmr.msra.gmra.mrb[0].mxu0 %v5237_v56  ;;  %2556 = vmatmul.mubr.bf16.vlgmr.msra.gmra.mrb[0].mxu1 %v5237_v56 }
 0x113   :  { %2442 = vmatpush1.bf16.msra.mxu0 %v4265_v53  ;;  %2565 = vmatpush1.bf16.msra.mxu1 %v4268_v50  ;;  %v293_v53 = vadd.f32 %v292_v6, %v174_v25  ;;  %v346_v50 = vrot.slane %v183_v39, 4 }
 0x114   :  { %2473 = vmatprep.mubr.bf16.mxu0 %v5243_v0  ;;  %2596 = vmatprep.mubr.bf16.mxu1 %v5243_v0 }
 0x115   :  { %2443 = vmatprep.subr.bf16.mxu0 %v4273_v59  ;;  %2566 = vmatprep.subr.bf16.mxu1 %v4276_v14  ;;  %v222_v59 = vrot.slane %v221_v37, 2  ;;  %v258_v14 = vrot.slane %v257_v42, 2  ;;  %v294_v18 = vrot.slane %v293_v53, 2  ;;  %v347_v19 = vadd.f32 %v346_v50, %v183_v39 }
 0x117   :  { %2444 = vmatpush1.bf16.msra.mxu0 %v4271_v58  ;;  %2567 = vmatpush1.bf16.msra.mxu1 %v4274_v1  ;;  %v311_v58 = vadd.f32 %v310_v54, %v177_v28  ;;  %v364_v1 = vrot.slane %v186_v57, 4  ;;  %v223_v8 = vadd.f32 %v222_v59, %v221_v37  ;;  %v259_v22 = vadd.f32 %v258_v14, %v257_v42  ;;  %v4313_v28 = vld [vmem:[#allocation6 + $0x480] ss:$24 sps:$4 sm:$0xff]   ;;  %v4324_v37 = vld [vmem:[#allocation6 + $0x4bc] ss:$24 sps:$4 sm:$0xff]  }
 0x118   :  { %2445 = vmatprep.subr.bf16.mxu0 %v4279_v2  ;;  %2568 = vmatprep.subr.bf16.mxu1 %v4282_v3  ;;  %v240_v2 = vrot.slane %v239_v41, 2  ;;  %v276_v3 = vrot.slane %v275_v55, 2 }
 0x119   :  { %v312_v25 = vrot.slane %v311_v58, 2  ;;  %v224_v42 = vrot.slane %v223_v8, 1  ;;  %v260_v54 = vrot.slane %v259_v22, 1 }
 0x11a   :  { %v277_v35 = vadd.f32 %v276_v3, %v275_v55 }
 0x11b   :  { %2446 = vmatpush1.bf16.msra.mxu0 %v4277_v5  ;;  %2569 = vmatpush1.bf16.msra.mxu1 %v4280_v7  ;;  %v4307_v5 = vld [vmem:[#allocation6 + $0x450] ss:$24 sps:$4 sm:$0xff]   ;;  %v225_v3 = vadd.f32 %v224_v42, %v223_v8  ;;  %v4333_v8 = vld [vmem:[#allocation6 + $0x514] ss:$24 sps:$4 sm:$0xff]  }
 0x11c   :  { %2447 = vmatprep.subr.bf16.mxu0 %v4285_v61  ;;  %2570 = vmatprep.subr.bf16.mxu1 %v4288_v23  ;;  %v4310_v7 = vld [vmem:[#allocation6 + $0x458] ss:$24 sps:$4 sm:$0xff]   ;;  %v329_v61 = vadd.f32 %v328_v45, %v180_v33  ;;  %v400_v23 = vrot.slane %v192_v13, 4 }
 0x11d   :  { %v4322_v45 = vld [vmem:[#allocation6 + $0x4b8] ss:$24 sps:$4 sm:$0xff]  }
 0x11e   :  { %v330_v32 = vrot.slane %v329_v61, 2  ;;  %v401_v33 = vadd.f32 %v400_v23, %v192_v13  ;;  %v419_v13 = vadd.f32 %v418_v48, %v195_v21 }
 0x11f   :  { %2448 = vmatpush1.bf16.msra.mxu0 %v4283_v11  ;;  %2571 = vmatpush1.bf16.msra.mxu1 %v4286_v15  ;;  %v382_v11 = vrot.slane %v189_v49, 4  ;;  %v198_v15 = vunpack.c.l.bf16 %v5183_v31  ;;  %v204_v31 = vunpack.c.l.bf16 %v5189_v47 }
 0x120   :  { %2449 = vmatprep.subr.bf16.mxu0 %v4291_v16  ;;  %2572 = vmatprep.subr.bf16.mxu1 %v4294_v17  ;;  %v4315_v16 = vld [vmem:[#allocation6 + $0x484] ss:$24 sps:$4 sm:$0xff]  }
 0x121   :  { %v4318_v17 = vld [vmem:[#allocation6 + $0x48c] ss:$24 sps:$4 sm:$0xff]   ;;  %v436_v6 = vrot.slane %v198_v15, 4 }
 0x123   :  { %2450 = vmatpush1.bf16.msra.mxu0 %v4289_v62  ;;  %2573 = vmatpush1.bf16.msra.mxu1 %v4292_v24  ;;  %v5274_v62 = vld [vmem:[#allocation3 + $0xb8] sm:$0xff]  ;;  %v201_v24 = vunpack.c.h.bf16 %v5270_v4  ;;  %v437_v59 = vadd.f32 %v436_v6, %v198_v15 }
 0x124   :  { %2451 = vmatprep.subr.bf16.mxu0 %v4297_v26  ;;  %2574 = vmatprep.subr.bf16.mxu1 %v4300_v34  ;;  %v365_v26 = vadd.f32 %v364_v1, %v186_v57  ;;  %v241_v34 = vadd.f32 %v240_v2, %v239_v41  ;;  %v207_v39 = vunpack.c.h.bf16 %v5274_v62  ;;  %v313_v57 = vadd.f32 %v312_v25, %v311_v58  ;;  %v4327_v58 = vld [vmem:[#allocation6 + $0x4e4] ss:$24 sps:$4 sm:$0xff]  }
 0x125   :  { %v454_v41 = vrot.slane %v201_v24, 4  ;;  %v4330_v2 = vld [vmem:[#allocation6 + $0x4ec] ss:$24 sps:$4 sm:$0xff]  }
 0x126   :  { %v366_v47 = vrot.slane %v365_v26, 2  ;;  %v242_v55 = vrot.slane %v241_v34, 1  ;;  %v490_v1 = vrot.slane %v207_v39, 4 }
 0x127   :  { %2452 = vmatpush1.bf16.msra.mxu0 %v4295_v29  ;;  %2575 = vmatpush1.bf16.msra.mxu1 %v4298_v43  ;;  %v383_v29 = vadd.f32 %v382_v11, %v189_v49  ;;  %v4321_v43 = vld [vmem:[#allocation6 + $0x4b4] ss:$24 sps:$4 sm:$0xff]   ;;  %v331_v49 = vadd.f32 %v330_v32, %v329_v61  ;;  %v455_v23 = vadd.f32 %v454_v41, %v201_v24 }
 0x128   :  { %2453 = vmatprep.subr.bf16.mxu0 %v4303_v38  ;;  %2576 = vmatprep.subr.bf16.mxu1 %v4306_v12  ;;  %v295_v38 = vadd.f32 %v294_v18, %v293_v53  ;;  %v348_v12 = vrot.slane %v347_v19, 2  ;;  %v472_v53 = vrot.slane %v204_v31, 4  ;;  %v367_v21 = vadd.f32 %v366_v47, %v365_v26  ;;  %v4325_v18 = vld [vmem:[#allocation6 + $0x4e0] ss:$24 sps:$4 sm:$0xff]   ;;  %v4342_v47 = vld [vmem:[#allocation6 + $0x54c] ss:$24 sps:$4 sm:$0xff]  }
 0x129   :  { %v384_v50 = vrot.slane %v383_v29, 2  ;;  %v243_v11 = vadd.f32 %v242_v55, %v241_v34  ;;  %v332_v25 = vrot.slane %v331_v49, 1  ;;  %v491_v32 = vadd.f32 %v490_v1, %v207_v39 }
 0x12a   :  { %v349_v14 = vadd.f32 %v348_v12, %v347_v19  ;;  %v473_v15 = vadd.f32 %v472_v53, %v204_v31  ;;  %v456_v34 = vrot.slane %v455_v23, 2 }
 0x12b   :  { %2454 = vmatpush1.bf16.msra.mxu0 %v4301_v44  ;;  %2577 = vmatpush1.bf16.msra.mxu1 %v4304_v60  ;;  %v278_v44 = vrot.slane %v277_v35, 1  ;;  %v4319_v60 = vld [vmem:[#allocation6 + $0x4b0] ss:$24 sps:$4 sm:$0xff]   ;;  %v385_v19 = vadd.f32 %v384_v50, %v383_v29  ;;  %v333_v12 = vadd.f32 %v332_v25, %v331_v49  ;;  %v4337_v49 = vld [vmem:[#allocation6 + $0x540] ss:$24 sps:$4 sm:$0xff]  }
 0x12c   :  { %2455 = vmatprep.subr.bf16.mxu0 %v4309_v52  ;;  %2578 = vmatprep.subr.bf16.mxu1 %v4312_v27  ;;  %v402_v52 = vrot.slane %v401_v33, 2  ;;  %v296_v27 = vrot.slane %v295_v38, 1  ;;  %v4331_v29 = vld [vmem:[#allocation6 + $0x510] ss:$24 sps:$4 sm:$0xff]   ;;  %v4351_v25 = vld [vmem:[#allocation6 + $0x5a4] ss:$24 sps:$4 sm:$0xff]  }
 0x12d   :  { %v279_v61 = vadd.f32 %v278_v44, %v277_v35  ;;  %v368_v35 = vrot.slane %v367_v21, 1  ;;  %v386_v39 = vrot.slane %v385_v19, 1  ;;  %v457_v44 = vadd.f32 %v456_v34, %v455_v23 }
 0x12e   :  { %v297_v48 = vadd.f32 %v296_v27, %v295_v38  ;;  %v403_v24 = vadd.f32 %v402_v52, %v401_v33  ;;  %v4334_v38 = vld [vmem:[#allocation6 + $0x518] ss:$24 sps:$4 sm:$0xff]   ;;  %v492_v33 = vrot.slane %v491_v32, 2  ;;  %v4340_v52 = vld [vmem:[#allocation6 + $0x548] ss:$24 sps:$4 sm:$0xff]  }
 0x12f   :  { %2456 = vmatpush1.bf16.msra.mxu0 %v4307_v5  ;;  %2579 = vmatpush1.bf16.msra.mxu1 %v4310_v7  ;;  %v261_v5 = vadd.f32 %v260_v54, %v259_v22  ;;  %v314_v7 = vrot.slane %v313_v57, 1  ;;  %v4336_v22 = vld [vmem:[#allocation6 + $0x51c] ss:$24 sps:$4 sm:$0xff]   ;;  %v586_v31 = vsel %vm544_vm0, %v279_v61, %v243_v11  ;;  %v387_v27 = vadd.f32 %v386_v39, %v385_v19  ;;  %v4346_v11 = vld [vmem:[#allocation6 + $0x578] ss:$24 sps:$4 sm:$0xff]  }
 0x130   :  { %2457 = vmatprep.subr.bf16.mxu0 %v4315_v16  ;;  %2580 = vmatprep.subr.bf16.mxu1 %v4318_v17  ;;  %v420_v16 = vrot.slane %v419_v13, 2  ;;  %v4328_v17 = vld [vmem:[#allocation6 + $0x4e8] ss:$24 sps:$4 sm:$0xff]   ;;  %v404_v55 = vrot.slane %v403_v24, 1 }
 0x131   :  { %v315_v26 = vadd.f32 %v314_v7, %v313_v57  ;;  %v4339_v57 = vld [vmem:[#allocation6 + $0x544] ss:$24 sps:$4 sm:$0xff]   ;;  %v4361_v39 = vld [vmem:[#allocation6 + $0x600] ss:$24 sps:$4 sm:$0xff]  }
 0x132   :  { %v421_v6 = vadd.f32 %v420_v16, %v419_v13 }
 0x133   :  { %2458 = vmatpush1.bf16.msra.mxu0 %v4313_v28  ;;  %2581 = vmatpush1.bf16.msra.mxu1 %v4316_v30  ;;  %v438_v28 = vrot.slane %v437_v59, 2  ;;  %v350_v30 = vrot.slane %v349_v14, 1  ;;  %v587_v13 = vsel %vm546_vm1, %v315_v26, %v586_v31  ;;  %v4360_v26 = vld [vmem:[#allocation6 + $0x5dc] ss:$24 sps:$4 sm:$0xff]  }
 0x134   :  { %2459 = vmatprep.subr.bf16.mxu0 %v4321_v43  ;;  %2582 = vmatprep.subr.bf16.mxu1 %v4324_v37  ;;  %v565_v43 = vsel %vm544_vm0, %v261_v5, %v225_v3  ;;  %v474_v37 = vrot.slane %v473_v15, 2  ;;  %v405_v3 = vadd.f32 %v404_v55, %v403_v24  ;;  %v458_v5 = vrot.slane %v457_v44, 1  ;;  %v4367_v55 = vld [vmem:[#allocation6 + $0x630] ss:$24 sps:$4 sm:$0xff]  }
 0x135   :  { %v439_v42 = vadd.f32 %v438_v28, %v437_v59  ;;  %v566_v54 = vsel %vm546_vm1, %v297_v48, %v565_v43  ;;  %v351_v41 = vadd.f32 %v350_v30, %v349_v14  ;;  %v493_v14 = vadd.f32 %v492_v33, %v491_v32  ;;  %v4349_v30 = vld [vmem:[#allocation6 + $0x5a0] ss:$24 sps:$4 sm:$0xff]   ;;  %v4357_v43 = vld [vmem:[#allocation6 + $0x5d4] ss:$24 sps:$4 sm:$0xff]  }
 0x136   :  { %v475_v53 = vadd.f32 %v474_v37, %v473_v15  ;;  %v567_v50 = vsel %vm548_vm2, %v333_v12, %v566_v54  ;;  %v4354_v15 = vld [vmem:[#allocation6 + $0x5ac] ss:$24 sps:$4 sm:$0xff]   ;;  %v459_v48 = vadd.f32 %v458_v5, %v457_v44  ;;  %v4352_v32 = vld [vmem:[#allocation6 + $0x5a8] ss:$24 sps:$4 sm:$0xff]   ;;  %v4372_v33 = vld [vmem:[#allocation6 + $0x63c] ss:$24 sps:$4 sm:$0xff]  }
 0x137   :  { %2460 = vmatpush1.bf16.msra.mxu0 %v4319_v60  ;;  %2583 = vmatpush1.bf16.msra.mxu1 %v4322_v45  ;;  %v369_v60 = vadd.f32 %v368_v35, %v367_v21  ;;  %v422_v45 = vrot.slane %v421_v6, 1  ;;  %v440_v59 = vrot.slane %v439_v42, 1  ;;  %v588_v1 = vsel %vm548_vm2, %v351_v41, %v587_v13  ;;  %v4343_v21 = vld [vmem:[#allocation6 + $0x570] ss:$24 sps:$4 sm:$0xff]   ;;  %v4366_v12 = vld [vmem:[#allocation6 + $0x60c] ss:$24 sps:$4 sm:$0xff]  }
 0x138   :  { %2461 = vmatprep.subr.bf16.mxu0 %v4327_v58  ;;  %2584 = vmatprep.subr.bf16.mxu1 %v4330_v2  ;;  %v4345_v58 = vld [vmem:[#allocation6 + $0x574] ss:$24 sps:$4 sm:$0xff]   ;;  %v476_v61 = vrot.slane %v475_v53, 1  ;;  %v589_v16 = vsel %vm550_vm3, %v387_v27, %v588_v1  ;;  %v4355_v35 = vld [vmem:[#allocation6 + $0x5d0] ss:$24 sps:$4 sm:$0xff]   ;;  %v176_v1 = vunpack.c.l.bf16 %v5253_v20 }
 0x139   :  { %v4348_v2 = vld [vmem:[#allocation6 + $0x57c] ss:$24 sps:$4 sm:$0xff]   ;;  %v568_v7 = vsel %vm550_vm3, %v369_v60, %v567_v50  ;;  %v423_v23 = vadd.f32 %v422_v45, %v421_v6  ;;  %v4358_v6 = vld [vmem:[#allocation6 + $0x5d8] ss:$24 sps:$4 sm:$0xff]   ;;  %v4364_v54 = vld [vmem:[#allocation6 + $0x608] ss:$24 sps:$4 sm:$0xff]  }
 0x13a   :  { %v569_v19 = vsel %vm552_vm4, %v405_v3, %v568_v7  ;;  %v4369_v41 = vld [vmem:[#allocation6 + $0x634] ss:$24 sps:$4 sm:$0xff]   ;;  %v4370_v44 = vld [vmem:[#allocation6 + $0x638] ss:$24 sps:$4 sm:$0xff]   ;;  %v4375_v13 = vld [vmem:[#allocation6 + $0x664] ss:$24 sps:$4 sm:$0xff]  }
 0x13b   :  { %2462 = vmatpush1.bf16.msra.mxu0 %v4325_v18  ;;  %2585 = vmatpush1.bf16.msra.mxu1 %v4328_v17  ;;  %v441_v18 = vadd.f32 %v440_v59, %v439_v42  ;;  %v494_v17 = vrot.slane %v493_v14, 1  ;;  %v590_v28 = vsel %vm552_vm4, %v423_v23, %v589_v16  ;;  %v4378_v60 = vld [vmem:[#allocation6 + $0x66c] ss:$24 sps:$4 sm:$0xff]   ;;  %v4373_v45 = vld [vmem:[#allocation6 + $0x660] ss:$24 sps:$4 sm:$0xff]   ;;  %v164_v59 = vunpack.c.l.bf16 %v5247_v40 }
 0x13c   :  { %2463 = vmatprep.subr.bf16.mxu0 %v4333_v8  ;;  %2586 = vmatprep.subr.bf16.mxu1 %v4336_v22  ;;  %v477_v8 = vadd.f32 %v476_v61, %v475_v53  ;;  %v591_v34 = vsel %vm554_vm5, %v459_v48, %v590_v28  ;;  %v4384_v53 = vld [vmem:[#allocation6 + $0x69c] ss:$24 sps:$4 sm:$0xff]   ;;  %v4379_v50 = vld [vmem:[#allocation6 + $0x690] ss:$24 sps:$4 sm:$0xff]   ;;  %v4385_v3 = vld [vmem:[#allocation6 + $0x6c0] ss:$24 sps:$4 sm:$0xff]   ;;  %v182_v23 = vunpack.c.l.bf16 %v5258_v63 }
 0x13d   :  { %v570_v22 = vsel %vm554_vm5, %v441_v18, %v569_v19  ;;  %v495_v24 = vadd.f32 %v494_v17, %v493_v14  ;;  %v4382_v27 = vld [vmem:[#allocation6 + $0x698] ss:$24 sps:$4 sm:$0xff]   ;;  %v170_v14 = vunpack.c.l.bf16 %v5249_v10  ;;  %v4388_v5 = vld [vmem:[#allocation6 + $0x6c8] ss:$24 sps:$4 sm:$0xff]   ;;  %v4393_v7 = vld [vmem:[#allocation6 + $0x6f4] ss:$24 sps:$4 sm:$0xff]   ;;  %v188_v18 = vunpack.c.l.bf16 %v5261_v9 }
 0x13e   :  { %v571_v31 = vsel %vm556_vm6, %v477_v8, %v570_v22  ;;  %v304_v40 = vrot.slane %v176_v1, 4  ;;  %v4391_v10 = vld [vmem:[#allocation6 + $0x6f0] ss:$24 sps:$4 sm:$0xff]   ;;  %v4399_v16 = vld [vmem:[#allocation6 + $0x724] ss:$24 sps:$4 sm:$0xff]   ;;  %v340_v19 = vrot.slane %v182_v23, 4 }
 0x13f   :  { %2464 = vmatpush1.bf16.msra.mxu0 %v4331_v29  ;;  %2587 = vmatpush1.bf16.msra.mxu1 %v4334_v38  ;;  %v592_v29 = vsel %vm556_vm6, %v495_v24, %v591_v34  ;;  %v4363_v38 = vld [vmem:[#allocation6 + $0x604] ss:$24 sps:$4 sm:$0xff]   ;;  %v630_v37 = vmul.f32 %v5230_v46, %v571_v31  ;;  %v268_v61 = vrot.slane %v170_v14, 4  ;;  %v4394_v20 = vld [vmem:[#allocation6 + $0x6f8] ss:$24 sps:$4 sm:$0xff]   ;;  %v376_v24 = vrot.slane %v188_v18, 4 }
 0x140   :  { %2465 = vmatprep.subr.bf16.mxu0 %v4339_v57  ;;  %2588 = vmatprep.subr.bf16.mxu1 %v4342_v47  ;;  %v633_v42 = vmul.f32 %v5230_v46, %v592_v29  ;;  %v4402_v17 = vld [vmem:[#allocation6 + $0x72c] ss:$24 sps:$4 sm:$0xff]   ;;  %v4397_v63 = vld [vmem:[#allocation6 + $0x720] ss:$24 sps:$4 sm:$0xff]   ;;  %v4408_v9 = vld [vmem:[#allocation6 + $0x75c] ss:$24 sps:$4 sm:$0xff]  }
 0x141   :  { %v5295_v57 = vpack.c.bf16 %v630_v37, %v630_v37  ;;  %v4400_v48 = vld [vmem:[#allocation6 + $0x728] ss:$24 sps:$4 sm:$0xff]   ;;  %v4405_v28 = vld [vmem:[#allocation6 + $0x754] ss:$24 sps:$4 sm:$0xff]   ;;  %v206_v37 = vunpack.c.l.bf16 %v5274_v62 }
 0x142   :  { %v5297_v47 = vpack.c.bf16 %v633_v42, %v633_v42 }
 0x143   :  { %2466 = vmatpush1.bf16.msra.mxu0 %v4337_v49  ;;  %2589 = vmatpush1.bf16.msra.mxu1 %v4340_v52  ;;  %v4376_v49 = vld [vmem:[#allocation6 + $0x668] ss:$24 sps:$4 sm:$0xff]   ;;  %v4381_v52 = vld [vmem:[#allocation6 + $0x694] ss:$24 sps:$4 sm:$0xff]  }
 0x144   :  { %2467 = vmatprep.subr.bf16.mxu0 %v4345_v58  ;;  %2590 = vmatprep.subr.bf16.mxu1 %v4348_v2  ;;  %v4387_v58 = vld [vmem:[#allocation6 + $0x6c4] ss:$24 sps:$4 sm:$0xff]  }
 0x145   :  { %v4390_v2 = vld [vmem:[#allocation6 + $0x6cc] ss:$24 sps:$4 sm:$0xff]  }
 0x147   :  { %2468 = vmatpush1.bf16.msra.mxu0 %v4343_v21  ;;  %2591 = vmatpush1.bf16.msra.mxu1 %v4346_v11  ;;  %v4396_v21 = vld [vmem:[#allocation6 + $0x6fc] ss:$24 sps:$4 sm:$0xff]   ;;  %v232_v11 = vrot.slane %v164_v59, 4 }
 0x148   :  { %2469 = vmatprep.subr.bf16.mxu0 %v4351_v25  ;;  %2592 = vmatprep.subr.bf16.mxu1 %v4354_v15  ;;  %v269_v15 = vadd.f32 %v268_v61, %v170_v14  ;;  %v4421_v61 = vld [vmem:[#allocation6 + $0x7e0] ss:$24 sps:$4 sm:$0xff]  }
 0x149   :  { %v233_v25 = vadd.f32 %v232_v11, %v164_v59 }
 0x14a   :  { %v270_v22 = vrot.slane %v269_v15, 2 }
 0x14b   :  { %2470 = vmatpush1.bf16.msra.mxu0 %v4349_v30  ;;  %2593 = vmatpush1.bf16.msra.mxu1 %v4352_v32  ;;  %v305_v30 = vadd.f32 %v304_v40, %v176_v1  ;;  %v194_v32 = vunpack.c.l.bf16 %v5265_v51  ;;  %v234_v8 = vrot.slane %v233_v25, 2  ;;  %v4406_v51 = vld [vmem:[#allocation6 + $0x758] ss:$24 sps:$4 sm:$0xff]  }
 0x14c   :  { %2471 = vmatprep.subr.bf16.mxu0 %v4357_v43  ;;  %2594 = vmatprep.subr.bf16.mxu1 %v4360_v26  ;;  %v341_v43 = vadd.f32 %v340_v19, %v182_v23  ;;  %v200_v26 = vunpack.c.l.bf16 %v5270_v4  ;;  %v271_v31 = vadd.f32 %v270_v22, %v269_v15  ;;  %v4409_v4 = vld [vmem:[#allocation6 + $0x780] ss:$24 sps:$4 sm:$0xff]   ;;  %v4438_v22 = vld [vmem:[#allocation6 + $0x84c] ss:$24 sps:$4 sm:$0xff]  }
 0x14d   :  { %v306_v34 = vrot.slane %v305_v30, 2  ;;  %v412_v29 = vrot.slane %v194_v32, 4 }
 0x14e   :  { %v342_v42 = vrot.slane %v341_v43, 2 }
 0x14f   :  { %2472 = vmatpush1.bf16.msra.mxu0 %v4355_v35  ;;  %2595 = vmatpush1.bf16.msra.mxu1 %v4358_v6  ;;  %v4403_v35 = vld [vmem:[#allocation6 + $0x750] ss:$24 sps:$4 sm:$0xff]   ;;  %v235_v6 = vadd.f32 %v234_v8, %v233_v25 }
 0x150   :  { %2482 = vmatprep.subr.bf16.mxu0 %v4363_v38  ;;  %2605 = vmatprep.subr.bf16.mxu1 %v4366_v12  ;;  %v4411_v38 = vld [vmem:[#allocation6 + $0x784] ss:$24 sps:$4 sm:$0xff]   ;;  %v377_v12 = vadd.f32 %v376_v24, %v188_v18 }
 0x152   :  { %2474 = vmatmul.mubr.bf16.vlgmr.msra.gmra.mrb[0].mxu0 %v5295_v57  ;;  %2597 = vmatmul.mubr.bf16.vlgmr.msra.gmra.mrb[0].mxu1 %v5295_v57 }
 0x153   :  { %2483 = vmatpush1.bf16.msra.mxu0 %v4361_v39  ;;  %2514 = vmatprep.mubr.bf16.mxu0 %v5297_v47  ;;  %v4414_v39 = vld [vmem:[#allocation6 + $0x78c] ss:$24 sps:$4 sm:$0xff]  }
 0x154   :  { %2606 = vmatpush1.bf16.msra.mxu1 %v4364_v54  ;;  %2637 = vmatprep.mubr.bf16.mxu1 %v5297_v47  ;;  %v307_v54 = vadd.f32 %v306_v34, %v305_v30  ;;  %v4430_v30 = vld [vmem:[#allocation6 + $0x818] ss:$24 sps:$4 sm:$0xff]  }
 0x155   :  { %2484 = vmatprep.subr.bf16.mxu0 %v4369_v41  ;;  %2607 = vmatprep.subr.bf16.mxu1 %v4372_v33  ;;  %v448_v41 = vrot.slane %v200_v26, 4  ;;  %v236_v33 = vrot.slane %v235_v6, 1 }
 0x156   :  { %v308_v62 = vrot.slane %v307_v54, 1 }
 0x157   :  { %2485 = vmatpush1.bf16.msra.mxu0 %v4367_v55  ;;  %v272_v55 = vrot.slane %v271_v31, 1  ;;  %v237_v59 = vadd.f32 %v236_v33, %v235_v6  ;;  %v4441_v6 = vld [vmem:[#allocation6 + $0x874] ss:$24 sps:$4 sm:$0xff]   ;;  %v4445_v33 = vld [vmem:[#allocation6 + $0x8a0] ss:$24 sps:$4 sm:$0xff]  }
 0x158   :  { %2608 = vmatpush1.bf16.msra.mxu1 %v4370_v44  ;;  %2486 = vmatprep.subr.bf16.mxu0 %v4375_v13  ;;  %v413_v44 = vadd.f32 %v412_v29, %v194_v32  ;;  %v4412_v13 = vld [vmem:[#allocation6 + $0x788] ss:$24 sps:$4 sm:$0xff]   ;;  %v4435_v32 = vld [vmem:[#allocation6 + $0x844] ss:$24 sps:$4 sm:$0xff]  }
 0x159   :  { %2609 = vmatprep.subr.bf16.mxu1 %v4378_v60  ;;  %v4417_v60 = vld [vmem:[#allocation6 + $0x7b4] ss:$24 sps:$4 sm:$0xff]   ;;  %v273_v14 = vadd.f32 %v272_v55, %v271_v31  ;;  %v4448_v55 = vld [vmem:[#allocation6 + $0x8a8] ss:$24 sps:$4 sm:$0xff]  }
 0x15a   :  { %v414_v1 = vrot.slane %v413_v44, 2  ;;  %v4444_v29 = vld [vmem:[#allocation6 + $0x87c] ss:$24 sps:$4 sm:$0xff]  }
 0x15b   :  { %2487 = vmatpush1.bf16.msra.mxu0 %v4373_v45  ;;  %v378_v45 = vrot.slane %v377_v12, 2 }
 0x15c   :  { %2610 = vmatpush1.bf16.msra.mxu1 %v4376_v49  ;;  %2488 = vmatprep.subr.bf16.mxu0 %v4381_v52  ;;  %v4420_v49 = vld [vmem:[#allocation6 + $0x7bc] ss:$24 sps:$4 sm:$0xff]   ;;  %v343_v52 = vadd.f32 %v342_v42, %v341_v43  ;;  %v415_v40 = vadd.f32 %v414_v1, %v413_v44 }
 0x15d   :  { %2611 = vmatprep.subr.bf16.mxu1 %v4384_v53  ;;  %v484_v53 = vrot.slane %v206_v37, 4  ;;  %v4447_v42 = vld [vmem:[#allocation6 + $0x8a4] ss:$24 sps:$4 sm:$0xff]   ;;  %v4453_v44 = vld [vmem:[#allocation6 + $0x8d4] ss:$24 sps:$4 sm:$0xff]  }
 0x15e   :  { %v4468_v1 = vld [vmem:[#allocation6 + $0xa4] ss:$24 sps:$4 sm:$0xff]  }
 0x15f   :  { %2489 = vmatpush1.bf16.msra.mxu0 %v4379_v50  ;;  %v449_v50 = vadd.f32 %v448_v41, %v200_v26  ;;  %v485_v23 = vadd.f32 %v484_v53, %v206_v37  ;;  %v4433_v26 = vld [vmem:[#allocation6 + $0x840] ss:$24 sps:$4 sm:$0xff]   ;;  %v4459_v53 = vld [vmem:[#allocation6 + $0x14] ss:$24 sps:$4 sm:$0xff]  }
 0x160   :  { %2612 = vmatpush1.bf16.msra.mxu1 %v4382_v27  ;;  %2490 = vmatprep.subr.bf16.mxu0 %v4387_v58  ;;  %v4415_v27 = vld [vmem:[#allocation6 + $0x7b0] ss:$24 sps:$4 sm:$0xff]  }
 0x161   :  { %2613 = vmatprep.subr.bf16.mxu1 %v4390_v2  ;;  %v4418_v58 = vld [vmem:[#allocation6 + $0x7b8] ss:$24 sps:$4 sm:$0xff]   ;;  %v4423_v2 = vld [vmem:[#allocation6 + $0x7e4] ss:$24 sps:$4 sm:$0xff]   ;;  %v450_v11 = vrot.slane %v449_v50, 2  ;;  %v486_v15 = vrot.slane %v485_v23, 2 }
 0x163   :  { %2491 = vmatpush1.bf16.msra.mxu0 %v4385_v3  ;;  %v379_v3 = vadd.f32 %v378_v45, %v377_v12  ;;  %v451_v19 = vadd.f32 %v450_v11, %v449_v50  ;;  %v487_v24 = vadd.f32 %v486_v15, %v485_v23  ;;  %v4439_v12 = vld [vmem:[#allocation6 + $0x870] ss:$24 sps:$4 sm:$0xff]   ;;  %v4477_v23 = vld [vmem:[#allocation6 + $0x134] ss:$24 sps:$4 sm:$0xff]   ;;  %v4478_v11 = vld [vmem:[#allocation6 + $0x160] ss:$24 sps:$4 sm:$0xff]  }
 0x164   :  { %2614 = vmatpush1.bf16.msra.mxu1 %v4388_v5  ;;  %2492 = vmatprep.subr.bf16.mxu0 %v4393_v7  ;;  %v4426_v5 = vld [vmem:[#allocation6 + $0x7ec] ss:$24 sps:$4 sm:$0xff]   ;;  %v344_v7 = vrot.slane %v343_v52, 1  ;;  %v4451_v45 = vld [vmem:[#allocation6 + $0x8d0] ss:$24 sps:$4 sm:$0xff]  }
 0x165   :  { %2615 = vmatprep.subr.bf16.mxu1 %v4396_v21  ;;  %v309_v21 = vadd.f32 %v308_v62, %v307_v54  ;;  %v380_v18 = vrot.slane %v379_v3, 1  ;;  %v452_v43 = vrot.slane %v451_v19, 1  ;;  %v4450_v54 = vld [vmem:[#allocation6 + $0x8ac] ss:$24 sps:$4 sm:$0xff]   ;;  %v4457_v62 = vld [vmem:[#allocation6 + $0x10] ss:$24 sps:$4 sm:$0xff]  }
 0x166   :  { %v345_v25 = vadd.f32 %v344_v7, %v343_v52  ;;  %v4472_v7 = vld [vmem:[#allocation6 + $0x100] ss:$24 sps:$4 sm:$0xff]   ;;  %v4492_v15 = vld [vmem:[#allocation6 + $0x224] ss:$24 sps:$4 sm:$0xff]  }
 0x167   :  { %2493 = vmatpush1.bf16.msra.mxu0 %v4391_v10  ;;  %v579_v10 = vsel %vm544_vm0, %v273_v14, %v237_v59  ;;  %v381_v8 = vadd.f32 %v380_v18, %v379_v3  ;;  %v4460_v59 = vld [vmem:[#allocation6 + $0x40] ss:$24 sps:$4 sm:$0xff]   ;;  %v4465_v14 = vld [vmem:[#allocation6 + $0x74] ss:$24 sps:$4 sm:$0xff]   ;;  %v4469_v3 = vld [vmem:[#allocation6 + $0xd0] ss:$24 sps:$4 sm:$0xff]  }
 0x168   :  { %2616 = vmatpush1.bf16.msra.mxu1 %v4394_v20  ;;  %2494 = vmatprep.subr.bf16.mxu0 %v4399_v16  ;;  %v4424_v20 = vld [vmem:[#allocation6 + $0x7e8] ss:$24 sps:$4 sm:$0xff]   ;;  %v4429_v16 = vld [vmem:[#allocation6 + $0x814] ss:$24 sps:$4 sm:$0xff]  }
 0x169   :  { %2617 = vmatprep.subr.bf16.mxu1 %v4402_v17  ;;  %v4432_v17 = vld [vmem:[#allocation6 + $0x81c] ss:$24 sps:$4 sm:$0xff]   ;;  %v4583_v18 = vld [vmem:[#allocation9] ss:$8 sps:$4 sm:$0xff]  }
 0x16b   :  { %2495 = vmatpush1.bf16.msra.mxu0 %v4397_v63  ;;  %v580_v63 = vsel %vm546_vm1, %v309_v21, %v579_v10  ;;  %v4480_v21 = vld [vmem:[#allocation6 + $0x164] ss:$24 sps:$4 sm:$0xff]  }
 0x16c   :  { %2618 = vmatpush1.bf16.msra.mxu1 %v4400_v48  ;;  %2496 = vmatprep.subr.bf16.mxu0 %v4405_v28  ;;  %v4427_v48 = vld [vmem:[#allocation6 + $0x810] ss:$24 sps:$4 sm:$0xff]   ;;  %v416_v28 = vrot.slane %v415_v40, 1  ;;  %v4486_v10 = vld [vmem:[#allocation6 + $0x1c4] ss:$24 sps:$4 sm:$0xff]  }
 0x16d   :  { %2619 = vmatprep.subr.bf16.mxu1 %v4408_v9  ;;  %v581_v9 = vsel %vm548_vm2, %v345_v25, %v580_v63  ;;  %v4487_v25 = vld [vmem:[#allocation6 + $0x1f0] ss:$24 sps:$4 sm:$0xff]   ;;  %v4591_v63 = vld [vmem:[#allocation9 + $0x14] ss:$8 sps:$4 sm:$0xff]  }
 0x16e   :  { %v417_v34 = vadd.f32 %v416_v28, %v415_v40  ;;  %v582_v31 = vsel %vm550_vm3, %v381_v8, %v581_v9  ;;  %v4481_v40 = vld [vmem:[#allocation6 + $0x190] ss:$24 sps:$4 sm:$0xff]   ;;  %v4495_v28 = vld [vmem:[#allocation6 + $0x254] ss:$24 sps:$4 sm:$0xff]   ;;  %v4603_v9 = vld [vmem:[#allocation9 + $0x34] ss:$8 sps:$4 sm:$0xff]  }
 0x16f   :  { %2497 = vmatpush1.bf16.msra.mxu0 %v4403_v35  ;;  %v4436_v35 = vld [vmem:[#allocation6 + $0x848] ss:$24 sps:$4 sm:$0xff]  }
 0x170   :  { %2620 = vmatpush1.bf16.msra.mxu1 %v4406_v51  ;;  %2498 = vmatprep.subr.bf16.mxu0 %v4411_v38  ;;  %v488_v51 = vrot.slane %v487_v24, 1  ;;  %v453_v38 = vadd.f32 %v452_v43, %v451_v19  ;;  %v583_v37 = vsel %vm552_vm4, %v417_v34, %v582_v31  ;;  %v4589_v19 = vld [vmem:[#allocation9 + $0x10] ss:$8 sps:$4 sm:$0xff]   ;;  %v4493_v8 = vld [vmem:[#allocation6 + $0x250] ss:$24 sps:$4 sm:$0xff]  }
 0x171   :  { %2621 = vmatprep.subr.bf16.mxu1 %v4414_v39  ;;  %v4442_v39 = vld [vmem:[#allocation6 + $0x878] ss:$24 sps:$4 sm:$0xff]   ;;  %v4504_v31 = vld [vmem:[#allocation6 + $0x2e4] ss:$24 sps:$4 sm:$0xff]  }
 0x172   :  { %v489_v41 = vadd.f32 %v488_v51, %v487_v24  ;;  %v4601_v24 = vld [vmem:[#allocation9 + $0x30] ss:$8 sps:$4 sm:$0xff]   ;;  %v4607_v34 = vld [vmem:[#allocation9 + $0x40] ss:$8 sps:$4 sm:$0xff]   ;;  %v4615_v51 = vld [vmem:[#allocation9 + $0x54] ss:$8 sps:$4 sm:$0xff]  }
 0x173   :  { %2499 = vmatpush1.bf16.msra.mxu0 %v4409_v4  ;;  %v584_v4 = vsel %vm554_vm5, %v453_v38, %v583_v37  ;;  %v4496_v43 = vld [vmem:[#allocation6 + $0x280] ss:$24 sps:$4 sm:$0xff]   ;;  %v4619_v37 = vld [vmem:[#allocation9 + $0x60] ss:$8 sps:$4 sm:$0xff]  }
 0x174   :  { %2622 = vmatpush1.bf16.msra.mxu1 %v4412_v13  ;;  %2500 = vmatprep.subr.bf16.mxu0 %v4417_v60  ;;  %v4456_v13 = vld [vmem:[#allocation6 + $0x8dc] ss:$24 sps:$4 sm:$0xff]   ;;  %v585_v60 = vsel %vm556_vm6, %v489_v41, %v584_v4  ;;  %v4502_v38 = vld [vmem:[#allocation6 + $0x2e0] ss:$24 sps:$4 sm:$0xff]  }
 0x175   :  { %2623 = vmatprep.subr.bf16.mxu1 %v4420_v49  ;;  %v4454_v49 = vld [vmem:[#allocation6 + $0x8d8] ss:$24 sps:$4 sm:$0xff]   ;;  %v632_v52 = vmul.f32 %v5230_v46, %v585_v60 }
 0x176   :  { %v4463_v46 = vld [vmem:[#allocation6 + $0x70] ss:$24 sps:$4 sm:$0xff]   ;;  %v4622_v41 = vld [vmem:[#allocation9 + $0x70] ss:$8 sps:$4 sm:$0xff]   ;;  %v4624_v4 = vld [vmem:[#allocation9 + $0x74] ss:$8 sps:$4 sm:$0xff]  }
 0x177   :  { %2501 = vmatpush1.bf16.msra.mxu0 %v4415_v27  ;;  %v5319_v50 = vpack.c.bf16 %v632_v52, %v632_v52  ;;  %v4462_v27 = vld [vmem:[#allocation6 + $0x44] ss:$24 sps:$4 sm:$0xff]   ;;  %v4633_v52 = vld [vmem:[#allocation9 + $0xa4] ss:$8 sps:$4 sm:$0xff]  }
 0x178   :  { %2624 = vmatpush1.bf16.msra.mxu1 %v4418_v58  ;;  %2502 = vmatprep.subr.bf16.mxu0 %v4423_v2  ;;  %v4466_v58 = vld [vmem:[#allocation6 + $0xa0] ss:$24 sps:$4 sm:$0xff]   ;;  %v4471_v2 = vld [vmem:[#allocation6 + $0xd4] ss:$24 sps:$4 sm:$0xff]  }
 0x179   :  { %2625 = vmatprep.subr.bf16.mxu1 %v4426_v5  ;;  %v4474_v5 = vld [vmem:[#allocation6 + $0x104] ss:$24 sps:$4 sm:$0xff]  }
 0x17a   :  { %v4630_v60 = vld [vmem:[#allocation9 + $0x94] ss:$8 sps:$4 sm:$0xff]  }
 0x17b   :  { %2503 = vmatpush1.bf16.msra.mxu0 %v4421_v61  ;;  %v4483_v61 = vld [vmem:[#allocation6 + $0x194] ss:$24 sps:$4 sm:$0xff]  }
 0x17c   :  { %2626 = vmatpush1.bf16.msra.mxu1 %v4424_v20  ;;  %2504 = vmatprep.subr.bf16.mxu0 %v4429_v16  ;;  %v4484_v20 = vld [vmem:[#allocation6 + $0x1c0] ss:$24 sps:$4 sm:$0xff]   ;;  %v4489_v16 = vld [vmem:[#allocation6 + $0x1f4] ss:$24 sps:$4 sm:$0xff]  }
 0x17d   :  { %2627 = vmatprep.subr.bf16.mxu1 %v4432_v17  ;;  %v4585_v17 = vld [vmem:[#allocation9 + $0x4] ss:$8 sps:$4 sm:$0xff]  }
 0x17f   :  { %2505 = vmatpush1.bf16.msra.mxu0 %v4427_v48  ;;  %v4490_v48 = vld [vmem:[#allocation6 + $0x220] ss:$24 sps:$4 sm:$0xff]  }
 0x180   :  { %2628 = vmatpush1.bf16.msra.mxu1 %v4430_v30  ;;  %2506 = vmatprep.subr.bf16.mxu0 %v4435_v32  ;;  %v4595_v30 = vld [vmem:[#allocation9 + $0x20] ss:$8 sps:$4 sm:$0xff]   ;;  %v4597_v32 = vld [vmem:[#allocation9 + $0x24] ss:$8 sps:$4 sm:$0xff]  }
 0x181   :  { %2629 = vmatprep.subr.bf16.mxu1 %v4438_v22  ;;  %v4498_v22 = vld [vmem:[#allocation6 + $0x284] ss:$24 sps:$4 sm:$0xff]  }
 0x183   :  { %2507 = vmatpush1.bf16.msra.mxu0 %v4433_v26  ;;  %v4501_v26 = vld [vmem:[#allocation6 + $0x2b4] ss:$24 sps:$4 sm:$0xff]  }
 0x184   :  { %2630 = vmatpush1.bf16.msra.mxu1 %v4436_v35  ;;  %2508 = vmatprep.subr.bf16.mxu0 %v4441_v6  ;;  %v4609_v35 = vld [vmem:[#allocation9 + $0x44] ss:$8 sps:$4 sm:$0xff]  }
 0x185   :  { %2631 = vmatprep.subr.bf16.mxu1 %v4444_v29  ;;  %v4499_v6 = vld [vmem:[#allocation6 + $0x2b0] ss:$24 sps:$4 sm:$0xff]   ;;  %v4613_v29 = vld [vmem:[#allocation9 + $0x50] ss:$8 sps:$4 sm:$0xff]  }
 0x187   :  { %2509 = vmatpush1.bf16.msra.mxu0 %v4439_v12  ;;  %v4507_v12 = vld [vmem:[#allocation6 + $0x314] ss:$24 sps:$4 sm:$0xff]  }
 0x188   :  { %2632 = vmatpush1.bf16.msra.mxu1 %v4442_v39  ;;  %2510 = vmatprep.subr.bf16.mxu0 %v4447_v42  ;;  %v4621_v39 = vld [vmem:[#allocation9 + $0x64] ss:$8 sps:$4 sm:$0xff]  }
 0x189   :  { %2633 = vmatprep.subr.bf16.mxu1 %v4450_v54  ;;  %v4505_v42 = vld [vmem:[#allocation6 + $0x310] ss:$24 sps:$4 sm:$0xff]   ;;  %v4510_v54 = vld [vmem:[#allocation6 + $0x344] ss:$24 sps:$4 sm:$0xff]  }
 0x18b   :  { %2511 = vmatpush1.bf16.msra.mxu0 %v4445_v33  ;;  %v4508_v33 = vld [vmem:[#allocation6 + $0x340] ss:$24 sps:$4 sm:$0xff]  }
 0x18c   :  { %2634 = vmatpush1.bf16.msra.mxu1 %v4448_v55  ;;  %2512 = vmatprep.subr.bf16.mxu0 %v4453_v44  ;;  %v4627_v55 = vld [vmem:[#allocation9 + $0x84] ss:$8 sps:$4 sm:$0xff]  }
 0x18d   :  { %2635 = vmatprep.subr.bf16.mxu1 %v4456_v13  ;;  %v4513_v44 = vld [vmem:[#allocation6 + $0x374] ss:$24 sps:$4 sm:$0xff]  }
 0x18e   :  { %v4625_v13 = vld [vmem:[#allocation9 + $0x80] ss:$8 sps:$4 sm:$0xff]  }
 0x18f   :  { %2513 = vmatpush1.bf16.msra.mxu0 %v4451_v45  ;;  %v4511_v45 = vld [vmem:[#allocation6 + $0x370] ss:$24 sps:$4 sm:$0xff]  }
 0x190   :  { %2636 = vmatpush1.bf16.msra.mxu1 %v4454_v49  ;;  %2646 = vmatprep.subr.bf16.mxu0 %v4459_v53  ;;  %v4516_v49 = vld [vmem:[#allocation6 + $0x3a4] ss:$24 sps:$4 sm:$0xff]   ;;  %v4514_v53 = vld [vmem:[#allocation6 + $0x3a0] ss:$24 sps:$4 sm:$0xff]  }
 0x191   :  { %3369 = vmatprep.subr.bf16.mxu1 %v4585_v17  ;;  %v4646_v17 = vld [vmem:[#allocation9 + $0xf0] ss:$8 sps:$4 sm:$0xff]  }
 0x192   :  { %2515 = vmatmul.mubr.bf16.vlgmr.msra.gmra.mrb[0].mxu0 %v5319_v50 }
 0x193   :  { %2638 = vmatmul.mubr.bf16.vlgmr.msra.gmra.mrb[0].mxu1 %v5319_v50  ;;  %2647 = vmatpush1.bf16.msra.mxu0 %v4457_v62  ;;  %v4631_v62 = vld [vmem:[#allocation9 + $0xa0] ss:$8 sps:$4 sm:$0xff]  }
 0x194   :  { %2678 = vmatprep.mubr.bf16.mxu0 %v5235_v36  ;;  %2648 = vmatprep.subr.bf16.mxu0 %v4462_v27  ;;  %v4475_v36 = vld [vmem:[#allocation6 + $0x130] ss:$24 sps:$4 sm:$0xff]   ;;  %v4636_v27 = vld [vmem:[#allocation9 + $0xb4] ss:$8 sps:$4 sm:$0xff]  }
 0x195   :  { %3370 = vmatpush1.bf16.msra.mxu1 %v4583_v18  ;;  %v4643_v18 = vld [vmem:[#allocation9 + $0xe0] ss:$8 sps:$4 sm:$0xff]  }
 0x196   :  { %3371 = vmatprep.subr.bf16.mxu1 %v4591_v63  ;;  %v4540_v63 = vld [vmem:[#allocation6 + $0x524] ss:$24 sps:$4 sm:$0xff]  }
 0x197   :  { %2649 = vmatpush1.bf16.msra.mxu0 %v4460_v59  ;;  %v4517_v59 = vld [vmem:[#allocation6 + $0x3d0] ss:$24 sps:$4 sm:$0xff]  }
 0x198   :  { %2650 = vmatprep.subr.bf16.mxu0 %v4465_v14  ;;  %v4522_v14 = vld [vmem:[#allocation6 + $0x404] ss:$24 sps:$4 sm:$0xff]  }
 0x199   :  { %3372 = vmatpush1.bf16.msra.mxu1 %v4589_v19  ;;  %v4651_v19 = vld [vmem:[#allocation9 + $0x104] ss:$8 sps:$4 sm:$0xff]  }
 0x19a   :  { %3373 = vmatprep.subr.bf16.mxu1 %v4597_v32  ;;  %v4546_v32 = vld [vmem:[#allocation6 + $0x584] ss:$24 sps:$4 sm:$0xff]  }
 0x19b   :  { %2651 = vmatpush1.bf16.msra.mxu0 %v4463_v46  ;;  %v4634_v46 = vld [vmem:[#allocation9 + $0xb0] ss:$8 sps:$4 sm:$0xff]  }
 0x19c   :  { %2652 = vmatprep.subr.bf16.mxu0 %v4468_v1  ;;  %v4520_v1 = vld [vmem:[#allocation6 + $0x400] ss:$24 sps:$4 sm:$0xff]  }
 0x19d   :  { %3374 = vmatpush1.bf16.msra.mxu1 %v4595_v30  ;;  %v4541_v30 = vld [vmem:[#allocation6 + $0x550] ss:$24 sps:$4 sm:$0xff]  }
 0x19e   :  { %3375 = vmatprep.subr.bf16.mxu1 %v4603_v9  ;;  %v4552_v9 = vld [vmem:[#allocation6 + $0x5e4] ss:$24 sps:$4 sm:$0xff]  }
 0x19f   :  { %2653 = vmatpush1.bf16.msra.mxu0 %v4466_v58  ;;  %v4525_v58 = vld [vmem:[#allocation6 + $0x434] ss:$24 sps:$4 sm:$0xff]  }
 0x1a0   :  { %2654 = vmatprep.subr.bf16.mxu0 %v4471_v2  ;;  %v4523_v2 = vld [vmem:[#allocation6 + $0x430] ss:$24 sps:$4 sm:$0xff]  }
 0x1a1   :  { %3376 = vmatpush1.bf16.msra.mxu1 %v4601_v24  ;;  %v4547_v24 = vld [vmem:[#allocation6 + $0x5b0] ss:$24 sps:$4 sm:$0xff]  }
 0x1a2   :  { %3377 = vmatprep.subr.bf16.mxu1 %v4609_v35  ;;  %v4558_v35 = vld [vmem:[#allocation6 + $0x644] ss:$24 sps:$4 sm:$0xff]  }
 0x1a3   :  { %2655 = vmatpush1.bf16.msra.mxu0 %v4469_v3  ;;  %v4528_v3 = vld [vmem:[#allocation6 + $0x464] ss:$24 sps:$4 sm:$0xff]  }
 0x1a4   :  { %2656 = vmatprep.subr.bf16.mxu0 %v4474_v5  ;;  %v4526_v5 = vld [vmem:[#allocation6 + $0x460] ss:$24 sps:$4 sm:$0xff]  }
 0x1a5   :  { %3378 = vmatpush1.bf16.msra.mxu1 %v4607_v34  ;;  %v4553_v34 = vld [vmem:[#allocation6 + $0x610] ss:$24 sps:$4 sm:$0xff]  }
 0x1a6   :  { %3379 = vmatprep.subr.bf16.mxu1 %v4615_v51  ;;  %v4564_v51 = vld [vmem:[#allocation6 + $0x6a4] ss:$24 sps:$4 sm:$0xff]  }
 0x1a7   :  { %2657 = vmatpush1.bf16.msra.mxu0 %v4472_v7  ;;  %v4639_v7 = vld [vmem:[#allocation9 + $0xc4] ss:$8 sps:$4 sm:$0xff]  }
 0x1a8   :  { %2658 = vmatprep.subr.bf16.mxu0 %v4477_v23  ;;  %v4531_v23 = vld [vmem:[#allocation6 + $0x494] ss:$24 sps:$4 sm:$0xff]  }
 0x1a9   :  { %3380 = vmatpush1.bf16.msra.mxu1 %v4613_v29  ;;  %v4559_v29 = vld [vmem:[#allocation6 + $0x670] ss:$24 sps:$4 sm:$0xff]  }
 0x1aa   :  { %3381 = vmatprep.subr.bf16.mxu1 %v4621_v39  ;;  %v4570_v39 = vld [vmem:[#allocation6 + $0x704] ss:$24 sps:$4 sm:$0xff]  }
 0x1ab   :  { %2659 = vmatpush1.bf16.msra.mxu0 %v4475_v36  ;;  %v4637_v36 = vld [vmem:[#allocation9 + $0xc0] ss:$8 sps:$4 sm:$0xff]  }
 0x1ac   :  { %2660 = vmatprep.subr.bf16.mxu0 %v4480_v21  ;;  %v4529_v21 = vld [vmem:[#allocation6 + $0x490] ss:$24 sps:$4 sm:$0xff]  }
 0x1ad   :  { %3382 = vmatpush1.bf16.msra.mxu1 %v4619_v37  ;;  %v4565_v37 = vld [vmem:[#allocation6 + $0x6d0] ss:$24 sps:$4 sm:$0xff]  }
 0x1ae   :  { %3383 = vmatprep.subr.bf16.mxu1 %v4624_v4  ;;  %v4579_v4 = vld [vmem:[#allocation6 + $0x794] ss:$24 sps:$4 sm:$0xff]  }
 0x1af   :  { %2661 = vmatpush1.bf16.msra.mxu0 %v4478_v11  ;;  %v4642_v11 = vld [vmem:[#allocation9 + $0xd4] ss:$8 sps:$4 sm:$0xff]  }
 0x1b0   :  { %2662 = vmatprep.subr.bf16.mxu0 %v4483_v61  ;;  %v4534_v61 = vld [vmem:[#allocation6 + $0x4c4] ss:$24 sps:$4 sm:$0xff]  }
 0x1b1   :  { %3384 = vmatpush1.bf16.msra.mxu1 %v4622_v41  ;;  %v4574_v41 = vld [vmem:[#allocation6 + $0x760] ss:$24 sps:$4 sm:$0xff]  }
 0x1b2   :  { %3385 = vmatprep.subr.bf16.mxu1 %v4627_v55  ;;  %v4582_v55 = vld [vmem:[#allocation6 + $0x7c4] ss:$24 sps:$4 sm:$0xff]  }
 0x1b3   :  { %2663 = vmatpush1.bf16.msra.mxu0 %v4481_v40  ;;  %v4640_v40 = vld [vmem:[#allocation9 + $0xd0] ss:$8 sps:$4 sm:$0xff]  }
 0x1b4   :  { %2664 = vmatprep.subr.bf16.mxu0 %v4486_v10  ;;  %v4532_v10 = vld [vmem:[#allocation6 + $0x4c0] ss:$24 sps:$4 sm:$0xff]  }
 0x1b5   :  { %3386 = vmatpush1.bf16.msra.mxu1 %v4625_v13  ;;  %v4588_v13 = vld [vmem:[#allocation6 + $0x7f4] ss:$24 sps:$4 sm:$0xff]  }
 0x1b6   :  { %3387 = vmatprep.subr.bf16.mxu1 %v4630_v60  ;;  %v4586_v60 = vld [vmem:[#allocation6 + $0x7f0] ss:$24 sps:$4 sm:$0xff]  }
 0x1b7   :  { %2665 = vmatpush1.bf16.msra.mxu0 %v4484_v20  ;;  %v4645_v20 = vld [vmem:[#allocation9 + $0xe4] ss:$8 sps:$4 sm:$0xff]  }
 0x1b8   :  { %2666 = vmatprep.subr.bf16.mxu0 %v4489_v16  ;;  %v4537_v16 = vld [vmem:[#allocation6 + $0x4f4] ss:$24 sps:$4 sm:$0xff]  }
 0x1bb   :  { %2667 = vmatpush1.bf16.msra.mxu0 %v4487_v25  ;;  %v4648_v25 = vld [vmem:[#allocation9 + $0xf4] ss:$8 sps:$4 sm:$0xff]  }
 0x1bc   :  { %2668 = vmatprep.subr.bf16.mxu0 %v4492_v15  ;;  %v4535_v15 = vld [vmem:[#allocation6 + $0x4f0] ss:$24 sps:$4 sm:$0xff]  }
 0x1bf   :  { %2669 = vmatpush1.bf16.msra.mxu0 %v4490_v48  ;;  %v4538_v48 = vld [vmem:[#allocation6 + $0x520] ss:$24 sps:$4 sm:$0xff]  }
 0x1c0   :  { %2670 = vmatprep.subr.bf16.mxu0 %v4495_v28  ;;  %v4543_v28 = vld [vmem:[#allocation6 + $0x554] ss:$24 sps:$4 sm:$0xff]  }
 0x1c3   :  { %2671 = vmatpush1.bf16.msra.mxu0 %v4493_v8  ;;  %v4544_v8 = vld [vmem:[#allocation6 + $0x580] ss:$24 sps:$4 sm:$0xff]  }
 0x1c4   :  { %2672 = vmatprep.subr.bf16.mxu0 %v4498_v22  ;;  %v4549_v22 = vld [vmem:[#allocation6 + $0x5b4] ss:$24 sps:$4 sm:$0xff]  }
 0x1c7   :  { %2673 = vmatpush1.bf16.msra.mxu0 %v4496_v43  ;;  %v4550_v43 = vld [vmem:[#allocation6 + $0x5e0] ss:$24 sps:$4 sm:$0xff]  }
 0x1c8   :  { %2674 = vmatprep.subr.bf16.mxu0 %v4501_v26  ;;  %v4555_v26 = vld [vmem:[#allocation6 + $0x614] ss:$24 sps:$4 sm:$0xff]  }
 0x1cb   :  { %2675 = vmatpush1.bf16.msra.mxu0 %v4499_v6  ;;  %v4556_v6 = vld [vmem:[#allocation6 + $0x640] ss:$24 sps:$4 sm:$0xff]  }
 0x1cc   :  { %2676 = vmatprep.subr.bf16.mxu0 %v4504_v31  ;;  %v4561_v31 = vld [vmem:[#allocation6 + $0x674] ss:$24 sps:$4 sm:$0xff]  }
 0x1cf   :  { %2677 = vmatpush1.bf16.msra.mxu0 %v4502_v38  ;;  %v4562_v38 = vld [vmem:[#allocation6 + $0x6a0] ss:$24 sps:$4 sm:$0xff]  }
 0x1d0   :  { %2687 = vmatprep.subr.bf16.mxu0 %v4507_v12  ;;  %v4567_v12 = vld [vmem:[#allocation6 + $0x6d4] ss:$24 sps:$4 sm:$0xff]  }
 0x1d2   :  { %2679 = vmatmul.mubr.bf16.vlgmr.msra.gmra.mrb[4].mxu0 %v5237_v56  ;;  %v4628_v56 = vld [vmem:[#allocation9 + $0x90] ss:$8 sps:$4 sm:$0xff]  }
 0x1d3   :  { %2688 = vmatpush1.bf16.msra.mxu0 %v4505_v42  ;;  %2719 = vmatprep.mubr.bf16.mxu0 %v5243_v0  ;;  %v4519_v0 = vld [vmem:[#allocation6 + $0x3d4] ss:$24 sps:$4 sm:$0xff]  }
 0x1d4   :  { %2689 = vmatprep.subr.bf16.mxu0 %v4510_v54  ;;  %3388 = vmatpush1.bf16.msra.mxu1 %v4628_v56  ;;  %v4573_v42 = vld [vmem:[#allocation6 + $0x734] ss:$24 sps:$4 sm:$0xff]   ;;  %v4576_v54 = vld [vmem:[#allocation6 + $0x764] ss:$24 sps:$4 sm:$0xff]  }
 0x1d5   :  { %3389 = vmatprep.subr.bf16.mxu1 %v4633_v52  ;;  %v4600_v56 = vld [vmem:[#allocation6 + $0x854] ss:$24 sps:$4 sm:$0xff]   ;;  %v4598_v52 = vld [vmem:[#allocation6 + $0x850] ss:$24 sps:$4 sm:$0xff]  }
 0x1d7   :  { %2690 = vmatpush1.bf16.msra.mxu0 %v4508_v33  ;;  %v4577_v33 = vld [vmem:[#allocation6 + $0x790] ss:$24 sps:$4 sm:$0xff]  }
 0x1d8   :  { %2691 = vmatprep.subr.bf16.mxu0 %v4513_v44  ;;  %3390 = vmatpush1.bf16.msra.mxu1 %v4631_v62  ;;  %v4580_v44 = vld [vmem:[#allocation6 + $0x7c0] ss:$24 sps:$4 sm:$0xff]   ;;  %v4612_v62 = vld [vmem:[#allocation6 + $0x8b4] ss:$24 sps:$4 sm:$0xff]  }
 0x1d9   :  { %3391 = vmatprep.subr.bf16.mxu1 %v4636_v27  ;;  %v4610_v27 = vld [vmem:[#allocation6 + $0x8b0] ss:$24 sps:$4 sm:$0xff]  }
 0x1db   :  { %2692 = vmatpush1.bf16.msra.mxu0 %v4511_v45  ;;  %v4594_v45 = vld [vmem:[#allocation6 + $0x824] ss:$24 sps:$4 sm:$0xff]  }
 0x1dc   :  { %2693 = vmatprep.subr.bf16.mxu0 %v4516_v49  ;;  %3392 = vmatpush1.bf16.msra.mxu1 %v4634_v46  ;;  %v4592_v49 = vld [vmem:[#allocation6 + $0x820] ss:$24 sps:$4 sm:$0xff]   ;;  %v930_v46 = vlaneseq }
 0x1dd   :  { %3393 = vmatprep.subr.bf16.mxu1 %v4639_v7 }
 0x1df   :  { %2694 = vmatpush1.bf16.msra.mxu0 %v4514_v53  ;;  %v4606_v53 = vld [vmem:[#allocation6 + $0x884] ss:$24 sps:$4 sm:$0xff]  }
 0x1e0   :  { %2695 = vmatprep.subr.bf16.mxu0 %v4519_v0  ;;  %3394 = vmatpush1.bf16.msra.mxu1 %v4637_v36  ;;  %v4604_v0 = vld [vmem:[#allocation6 + $0x880] ss:$24 sps:$4 sm:$0xff]  }
 0x1e1   :  { %3395 = vmatprep.subr.bf16.mxu1 %v4642_v11 }
 0x1e3   :  { %2696 = vmatpush1.bf16.msra.mxu0 %v4517_v59  ;;  %v4618_v59 = vld [vmem:[#allocation6 + $0x8e4] ss:$24 sps:$4 sm:$0xff]  }
 0x1e4   :  { %2697 = vmatprep.subr.bf16.mxu0 %v4522_v14  ;;  %3396 = vmatpush1.bf16.msra.mxu1 %v4640_v40  ;;  %v4616_v14 = vld [vmem:[#allocation6 + $0x8e0] ss:$24 sps:$4 sm:$0xff]  }
 0x1e5   :  { %3397 = vmatprep.subr.bf16.mxu1 %v4645_v20 }
 0x1e7   :  { %2698 = vmatpush1.bf16.msra.mxu0 %v4520_v1  ;;  %v5329_v1 = vshrl.u32 %v930_v46, 7  ;;  %v4702_v46 = vld [vmem:[#allocation9 + $0x214] ss:$8 sps:$4 sm:$0xff]  }
 0x1e8   :  { %2699 = vmatprep.subr.bf16.mxu0 %v4525_v58  ;;  %3398 = vmatpush1.bf16.msra.mxu1 %v4643_v18 }
 0x1e9   :  { %3399 = vmatprep.subr.bf16.mxu1 %v4648_v25  ;;  %v932_v58 = vsub.s32 0, %v5329_v1 }
 0x1eb   :  { %2700 = vmatpush1.bf16.msra.mxu0 %v4523_v2  ;;  %v5332_v2 = vld [vmem:[#allocation8] sm:$0x3f] }
 0x1ec   :  { %2701 = vmatprep.subr.bf16.mxu0 %v4528_v3  ;;  %3400 = vmatpush1.bf16.msra.mxu1 %v4646_v17  ;;  %v936_v3 = vsub.s32 1, %v5329_v1  ;;  %v933_v7 = vrot.slane %v5332_v2, %v932_v58 }
 0x1ed   :  { %3410 = vmatprep.subr.bf16.mxu1 %v4651_v19 }
 0x1ef   :  { %2702 = vmatpush1.bf16.msra.mxu0 %v4526_v5  ;;  %v944_v5 = vsub.s32 3, %v5329_v1 }
 0x1f0   :  { %2703 = vmatprep.subr.bf16.mxu0 %v4531_v23  ;;  %v937_v23 = vrot.slane %v5332_v2, %v936_v3 }
 0x1f3   :  { %2704 = vmatpush1.bf16.msra.mxu0 %v4529_v21 }
 0x1f4   :  { %2705 = vmatprep.subr.bf16.mxu0 %v4534_v61 }
 0x1f7   :  { %2706 = vmatpush1.bf16.msra.mxu0 %v4532_v10 }
 0x1f8   :  { %2707 = vmatprep.subr.bf16.mxu0 %v4537_v16 }
 0x1fb   :  { %2708 = vmatpush1.bf16.msra.mxu0 %v4535_v15 }
 0x1fc   :  { %2709 = vmatprep.subr.bf16.mxu0 %v4540_v63 }
 0x1ff   :  { %2710 = vmatpush1.bf16.msra.mxu0 %v4538_v48 }
 0x200   :  { %2711 = vmatprep.subr.bf16.mxu0 %v4543_v28  ;;  %v4649_v28 = vld [vmem:[#allocation9 + $0x100] ss:$8 sps:$4 sm:$0xff]  }
 0x203   :  { %2712 = vmatpush1.bf16.msra.mxu0 %v4541_v30 }
 0x204   :  { %2713 = vmatprep.subr.bf16.mxu0 %v4546_v32  ;;  %v4654_v32 = vld [vmem:[#allocation9 + $0x114] ss:$8 sps:$4 sm:$0xff]  }
 0x207   :  { %2714 = vmatpush1.bf16.msra.mxu0 %v4544_v8 }
 0x208   :  { %2715 = vmatprep.subr.bf16.mxu0 %v4549_v22  ;;  %v4652_v22 = vld [vmem:[#allocation9 + $0x110] ss:$8 sps:$4 sm:$0xff]  }
 0x20b   :  { %2716 = vmatpush1.bf16.msra.mxu0 %v4547_v24  ;;  %v4657_v24 = vld [vmem:[#allocation9 + $0x124] ss:$8 sps:$4 sm:$0xff]  }
 0x20c   :  { %2717 = vmatprep.subr.bf16.mxu0 %v4552_v9  ;;  %v4655_v9 = vld [vmem:[#allocation9 + $0x120] ss:$8 sps:$4 sm:$0xff]  }
 0x20f   :  { %2718 = vmatpush1.bf16.msra.mxu0 %v4550_v43  ;;  %v4660_v43 = vld [vmem:[#allocation9 + $0x134] ss:$8 sps:$4 sm:$0xff]  }
 0x210   :  { %2728 = vmatprep.subr.bf16.mxu0 %v4555_v26  ;;  %v4658_v26 = vld [vmem:[#allocation9 + $0x130] ss:$8 sps:$4 sm:$0xff]  }
 0x212   :  { %2720 = vmatmul.mubr.bf16.vlgmr.msra.gmra.mrb[4].mxu0 %v5295_v57  ;;  %v4568_v57 = vld [vmem:[#allocation6 + $0x700] ss:$24 sps:$4 sm:$0xff]  }
 0x213   :  { %2729 = vmatpush1.bf16.msra.mxu0 %v4553_v34  ;;  %2760 = vmatprep.mubr.bf16.mxu0 %v5297_v47  ;;  %v4571_v47 = vld [vmem:[#allocation6 + $0x730] ss:$24 sps:$4 sm:$0xff]  }
 0x214   :  { %2730 = vmatprep.subr.bf16.mxu0 %v4558_v35  ;;  %v4663_v34 = vld [vmem:[#allocation9 + $0x144] ss:$8 sps:$4 sm:$0xff]   ;;  %v4661_v35 = vld [vmem:[#allocation9 + $0x140] ss:$8 sps:$4 sm:$0xff]  }
 0x217   :  { %2731 = vmatpush1.bf16.msra.mxu0 %v4556_v6  ;;  %v4666_v6 = vld [vmem:[#allocation9 + $0x154] ss:$8 sps:$4 sm:$0xff]  }
 0x218   :  { %2732 = vmatprep.subr.bf16.mxu0 %v4561_v31  ;;  %v4664_v31 = vld [vmem:[#allocation9 + $0x150] ss:$8 sps:$4 sm:$0xff]  }
 0x21b   :  { %2733 = vmatpush1.bf16.msra.mxu0 %v4559_v29  ;;  %v4669_v29 = vld [vmem:[#allocation9 + $0x164] ss:$8 sps:$4 sm:$0xff]  }
 0x21c   :  { %2734 = vmatprep.subr.bf16.mxu0 %v4564_v51  ;;  %v4667_v51 = vld [vmem:[#allocation9 + $0x160] ss:$8 sps:$4 sm:$0xff]  }
 0x21f   :  { %2735 = vmatpush1.bf16.msra.mxu0 %v4562_v38  ;;  %v4672_v38 = vld [vmem:[#allocation9 + $0x174] ss:$8 sps:$4 sm:$0xff]  }
 0x220   :  { %2736 = vmatprep.subr.bf16.mxu0 %v4567_v12  ;;  %v4670_v12 = vld [vmem:[#allocation9 + $0x170] ss:$8 sps:$4 sm:$0xff]  }
 0x223   :  { %2737 = vmatpush1.bf16.msra.mxu0 %v4565_v37  ;;  %v4675_v37 = vld [vmem:[#allocation9 + $0x184] ss:$8 sps:$4 sm:$0xff]  }
 0x224   :  { %2738 = vmatprep.subr.bf16.mxu0 %v4570_v39  ;;  %v4673_v39 = vld [vmem:[#allocation9 + $0x180] ss:$8 sps:$4 sm:$0xff]  }
 0x227   :  { %2739 = vmatpush1.bf16.msra.mxu0 %v4568_v57  ;;  %v4678_v57 = vld [vmem:[#allocation9 + $0x194] ss:$8 sps:$4 sm:$0xff]  }
 0x228   :  { %2740 = vmatprep.subr.bf16.mxu0 %v4573_v42  ;;  %v4676_v42 = vld [vmem:[#allocation9 + $0x190] ss:$8 sps:$4 sm:$0xff]  }
 0x22b   :  { %2741 = vmatpush1.bf16.msra.mxu0 %v4571_v47  ;;  %v4681_v47 = vld [vmem:[#allocation9 + $0x1a4] ss:$8 sps:$4 sm:$0xff]  }
 0x22c   :  { %2742 = vmatprep.subr.bf16.mxu0 %v4576_v54  ;;  %v940_v54 = vsub.s32 2, %v5329_v1 }
 0x22f   :  { %2743 = vmatpush1.bf16.msra.mxu0 %v4574_v41  ;;  %v4679_v41 = vld [vmem:[#allocation9 + $0x1a0] ss:$8 sps:$4 sm:$0xff]  }
 0x230   :  { %2744 = vmatprep.subr.bf16.mxu0 %v4579_v4  ;;  %v4684_v4 = vld [vmem:[#allocation9 + $0x1b4] ss:$8 sps:$4 sm:$0xff]  }
 0x233   :  { %2745 = vmatpush1.bf16.msra.mxu0 %v4577_v33  ;;  %v941_v33 = vrot.slane %v5332_v2, %v940_v54  ;;  %v948_v54 = vsub.s32 4, %v5329_v1 }
 0x234   :  { %2746 = vmatprep.subr.bf16.mxu0 %v4582_v55  ;;  %v4682_v55 = vld [vmem:[#allocation9 + $0x1b0] ss:$8 sps:$4 sm:$0xff]  }
 0x237   :  { %2747 = vmatpush1.bf16.msra.mxu0 %v4580_v44  ;;  %v4687_v44 = vld [vmem:[#allocation9 + $0x1c4] ss:$8 sps:$4 sm:$0xff]  }
 0x238   :  { %2748 = vmatprep.subr.bf16.mxu0 %v4588_v13 }
 0x23b   :  { %2749 = vmatpush1.bf16.msra.mxu0 %v4586_v60  ;;  %v4685_v60 = vld [vmem:[#allocation9 + $0x1c0] ss:$8 sps:$4 sm:$0xff]  }
 0x23c   :  { %2750 = vmatprep.subr.bf16.mxu0 %v4594_v45  ;;  %v4690_v45 = vld [vmem:[#allocation9 + $0x1d4] ss:$8 sps:$4 sm:$0xff]  }
 0x23f   :  { %2751 = vmatpush1.bf16.msra.mxu0 %v4592_v49  ;;  %v4688_v49 = vld [vmem:[#allocation9 + $0x1d0] ss:$8 sps:$4 sm:$0xff]  }
 0x240   :  { %2752 = vmatprep.subr.bf16.mxu0 %v4600_v56  ;;  %v4693_v56 = vld [vmem:[#allocation9 + $0x1e4] ss:$8 sps:$4 sm:$0xff]  }
 0x243   :  { %2753 = vmatpush1.bf16.msra.mxu0 %v4598_v52  ;;  %v4691_v52 = vld [vmem:[#allocation9 + $0x1e0] ss:$8 sps:$4 sm:$0xff]  }
 0x244   :  { %2754 = vmatprep.subr.bf16.mxu0 %v4606_v53  ;;  %v4696_v53 = vld [vmem:[#allocation9 + $0x1f4] ss:$8 sps:$4 sm:$0xff]  }
 0x247   :  { %2755 = vmatpush1.bf16.msra.mxu0 %v4604_v0  ;;  %v4694_v0 = vld [vmem:[#allocation9 + $0x1f0] ss:$8 sps:$4 sm:$0xff]  }
 0x248   :  { %2756 = vmatprep.subr.bf16.mxu0 %v4612_v62  ;;  %v4699_v62 = vld [vmem:[#allocation9 + $0x204] ss:$8 sps:$4 sm:$0xff]  }
 0x24b   :  { %2757 = vmatpush1.bf16.msra.mxu0 %v4610_v27 }
 0x24c   :  { %2758 = vmatprep.subr.bf16.mxu0 %v4618_v59  ;;  %v4697_v59 = vld [vmem:[#allocation9 + $0x200] ss:$8 sps:$4 sm:$0xff]  }
 0x24f   :  { %2759 = vmatpush1.bf16.msra.mxu0 %v4616_v14 }
 0x252   :  { %2761 = vmatmul.mubr.bf16.vlgmr.msra.gmra.mrb[4].mxu0 %v5319_v50  ;;  %v945_v50 = vrot.slane %v5332_v2, %v944_v5  ;;  %v4745_v5 = vld [vmem:[#allocation12 + $0x40] sm:$0xff]  }
 0x253   :  { %4091 = vmatprep.subr.bf16.mxu0 %v4745_v5 }
 0x265   :  { %v2516_v36 = vpop.f32.mrb[0].mxu0 }
 0x266   :  { %v4113_v21 = vadd.f32 %v2516_v36, %v933_v7  ;;  %v5343_v11 = vpop.f32.mrb[0].mxu1  ;;  %v2518_v61 = vpop.f32.mrb[1].mxu0  ;;  %v4746_v7 = vld [vmem:[#allocation12] sm:$0xff]  }
 0x267   :  { %v4114_v40 = vadd.f32 %v2518_v61, %v937_v23  ;;  %v2641_v10 = vpop.f32.mrb[1].mxu1  ;;  %v2520_v20 = vpop.f32.mrb[2].mxu0  ;;  %v4115_v13 = vadd.f32 %v5343_v11, %v941_v33  ;;  %v4747_v23 = vld [vmem:[#allocation12 + $0x48] sm:$0xff]   ;;  %4092 = vmatpush3.bf16.msra.mxu0 %v4746_v7  ;;  %v4749_v11 = vld [vmem:[#allocation12 + $0x50] sm:$0xff]  }
 0x268   :  { %v4116_v16 = vadd.f32 %v2641_v10, %v945_v50  ;;  %v2643_v18 = vpop.f32.mrb[2].mxu1  ;;  %v2521_v17 = vpop.f32.mrb[3].mxu0  ;;  %4763 = vtanh.f32 %v4113_v21  ;;  %v4700_v50 = vld [vmem:[#allocation9 + $0x210] ss:$8 sps:$4 sm:$0xff]   ;;  %v4705_v36 = vld [vmem:[#allocation9 + $0x224] ss:$8 sps:$4 sm:$0xff]   ;;  %4093 = vmatprep.subr.bf16.mxu0 %v4747_v23 }
 0x269   :  { %v2644_v25 = vpop.f32.mrb[3].mxu1  ;;  %4765 = vtanh.f32 %v4114_v40  ;;  %v4748_v21 = vld [vmem:[#allocation12 + $0x8] sm:$0xff]   ;;  %v4708_v40 = vld [vmem:[#allocation9 + $0x234] ss:$8 sps:$4 sm:$0xff]  }
 0x26a   :  { %4767 = vtanh.f32 %v4116_v16  ;;  %v4703_v61 = vld [vmem:[#allocation9 + $0x220] ss:$8 sps:$4 sm:$0xff]   ;;  %v4750_v10 = vld [vmem:[#allocation12 + $0x10] sm:$0xff]   ;;  %v4711_v18 = vld [vmem:[#allocation9 + $0x244] ss:$8 sps:$4 sm:$0xff]  }
 0x26b   :  { %4769 = vtanh.f32 %v4115_v13  ;;  %4094 = vmatpush3.bf16.msra.mxu0 %v4748_v21  ;;  %v4751_v20 = vld [vmem:[#allocation12 + $0x58] sm:$0xff]   ;;  %v4753_v25 = vld [vmem:[#allocation12 + $0x60] sm:$0xff]  }
 0x26c   :  { %4095 = vmatprep.subr.bf16.mxu0 %v4749_v11  ;;  %v4706_v16 = vld [vmem:[#allocation9 + $0x230] ss:$8 sps:$4 sm:$0xff]  }
 0x26d   :  { %v4752_v17 = vld [vmem:[#allocation12 + $0x18] sm:$0xff]  }
 0x26f   :  { %4096 = vmatpush3.bf16.msra.mxu0 %v4750_v10 }
 0x270   :  { %4097 = vmatprep.subr.bf16.mxu0 %v4751_v20 }
 0x272   :  { %v4764_v15 = vpop.eup %4763 }
 0x273   :  { %v4766_v19 = vpop.eup %4765  ;;  %v2775_v30 = vpack.c.bf16 %v4764_v15, %v4764_v15  ;;  %v4709_v15 = vld [vmem:[#allocation9 + $0x240] ss:$8 sps:$4 sm:$0xff]   ;;  %4098 = vmatpush3.bf16.msra.mxu0 %v4752_v17 }
 0x274   :  { %v4768_v63 = vpop.eup %4767  ;;  %v2776_v48 = vpack.c.bf16 %v4766_v19, %v4766_v19  ;;  %v4714_v19 = vld [vmem:[#allocation9 + $0x254] ss:$8 sps:$4 sm:$0xff]   ;;  %4099 = vmatprep.subr.bf16.mxu0 %v4753_v25 }
 0x275   :  { %v2778_v8 = vpack.c.bf16 %v4768_v63, %v4768_v63  ;;  %v4770_v27 = vpop.eup %4769  ;;  %v4754_v63 = vld [vmem:[#allocation12 + $0x20] sm:$0xff]  }
 0x276   :  { %3401 = vmatprep.mubr.bf16.mxu1 %v2776_v48  ;;  %v2777_v14 = vpack.c.bf16 %v4770_v27, %v4770_v27  ;;  %v4755_v48 = vld [vmem:[#allocation12 + $0x68] sm:$0xff]   ;;  %v4758_v27 = vld [vmem:[#allocation12 + $0x30] sm:$0xff]  }
 0x277   :  { %3402 = vmatmul.mubr.bf16.vlgmr.msra.gmra.mrb[4].mxu1 %v2775_v30  ;;  %v4717_v30 = vld [vmem:[#allocation9 + $0x264] ss:$8 sps:$4 sm:$0xff]   ;;  %4100 = vmatpush3.bf16.msra.mxu0 %v4754_v63 }
 0x278   :  { %3411 = vmatpush1.bf16.msra.mxu1 %v4649_v28  ;;  %3442 = vmatprep.mubr.bf16.mxu1 %v2778_v8  ;;  %v4712_v28 = vld [vmem:[#allocation9 + $0x250] ss:$8 sps:$4 sm:$0xff]   ;;  %v4715_v8 = vld [vmem:[#allocation9 + $0x260] ss:$8 sps:$4 sm:$0xff]  }
 0x279   :  { %3412 = vmatprep.subr.bf16.mxu1 %v4654_v32  ;;  %v4756_v32 = vld [vmem:[#allocation12 + $0x28] sm:$0xff]   ;;  %4101 = vmatprep.subr.bf16.mxu0 %v4755_v48 }
 0x27b   :  { %4102 = vmatpush3.bf16.msra.mxu0 %v4756_v32 }
 0x27c   :  { %3413 = vmatpush1.bf16.msra.mxu1 %v4652_v22  ;;  %v4720_v22 = vld [vmem:[#allocation9 + $0x274] ss:$8 sps:$4 sm:$0xff]  }
 0x27d   :  { %3414 = vmatprep.subr.bf16.mxu1 %v4657_v24  ;;  %v4718_v24 = vld [vmem:[#allocation9 + $0x270] ss:$8 sps:$4 sm:$0xff]  }
 0x280   :  { %3415 = vmatpush1.bf16.msra.mxu1 %v4655_v9  ;;  %v4723_v9 = vld [vmem:[#allocation9 + $0x284] ss:$8 sps:$4 sm:$0xff]  }
 0x281   :  { %3416 = vmatprep.subr.bf16.mxu1 %v4660_v43  ;;  %v4721_v43 = vld [vmem:[#allocation9 + $0x280] ss:$8 sps:$4 sm:$0xff]  }
 0x284   :  { %3417 = vmatpush1.bf16.msra.mxu1 %v4658_v26  ;;  %v4726_v26 = vld [vmem:[#allocation9 + $0x294] ss:$8 sps:$4 sm:$0xff]  }
 0x285   :  { %3418 = vmatprep.subr.bf16.mxu1 %v4663_v34  ;;  %v4724_v34 = vld [vmem:[#allocation9 + $0x290] ss:$8 sps:$4 sm:$0xff]  }
 0x288   :  { %3419 = vmatpush1.bf16.msra.mxu1 %v4661_v35  ;;  %v4729_v35 = vld [vmem:[#allocation9 + $0x2a4] ss:$8 sps:$4 sm:$0xff]  }
 0x289   :  { %3420 = vmatprep.subr.bf16.mxu1 %v4666_v6  ;;  %v4727_v6 = vld [vmem:[#allocation9 + $0x2a0] ss:$8 sps:$4 sm:$0xff]  }
 0x28c   :  { %3421 = vmatpush1.bf16.msra.mxu1 %v4664_v31  ;;  %v4732_v31 = vld [vmem:[#allocation9 + $0x2b4] ss:$8 sps:$4 sm:$0xff]  }
 0x28d   :  { %3422 = vmatprep.subr.bf16.mxu1 %v4669_v29  ;;  %v4730_v29 = vld [vmem:[#allocation9 + $0x2b0] ss:$8 sps:$4 sm:$0xff]  }
 0x290   :  { %3423 = vmatpush1.bf16.msra.mxu1 %v4667_v51  ;;  %v4735_v51 = vld [vmem:[#allocation9 + $0x2c4] ss:$8 sps:$4 sm:$0xff]  }
 0x291   :  { %3424 = vmatprep.subr.bf16.mxu1 %v4672_v38  ;;  %v4733_v38 = vld [vmem:[#allocation9 + $0x2c0] ss:$8 sps:$4 sm:$0xff]  }
 0x294   :  { %3425 = vmatpush1.bf16.msra.mxu1 %v4670_v12  ;;  %v4738_v12 = vld [vmem:[#allocation9 + $0x2d4] ss:$8 sps:$4 sm:$0xff]  }
 0x295   :  { %3426 = vmatprep.subr.bf16.mxu1 %v4675_v37  ;;  %v4736_v37 = vld [vmem:[#allocation9 + $0x2d0] ss:$8 sps:$4 sm:$0xff]  }
 0x298   :  { %3427 = vmatpush1.bf16.msra.mxu1 %v4673_v39  ;;  %v4741_v39 = vld [vmem:[#allocation9 + $0x2e4] ss:$8 sps:$4 sm:$0xff]  }
 0x299   :  { %3428 = vmatprep.subr.bf16.mxu1 %v4678_v57  ;;  %v4739_v57 = vld [vmem:[#allocation9 + $0x2e0] ss:$8 sps:$4 sm:$0xff]  }
 0x29c   :  { %3429 = vmatpush1.bf16.msra.mxu1 %v4676_v42  ;;  %v4744_v42 = vld [vmem:[#allocation9 + $0x2f4] ss:$8 sps:$4 sm:$0xff]  }
 0x29d   :  { %3430 = vmatprep.subr.bf16.mxu1 %v4681_v47  ;;  %v4742_v47 = vld [vmem:[#allocation9 + $0x2f0] ss:$8 sps:$4 sm:$0xff]  }
 0x2a0   :  { %3431 = vmatpush1.bf16.msra.mxu1 %v4679_v41  ;;  %v952_v41 = vsub.s32 5, %v5329_v1 }
 0x2a1   :  { %3432 = vmatprep.subr.bf16.mxu1 %v4684_v4  ;;  %v949_v4 = vrot.slane %v5332_v2, %v948_v54 }
 0x2a2   :  { %v953_v33 = vrot.slane %v5332_v2, %v952_v41  ;;  %v4760_v2 = vld [vmem:[#allocation12 + $0x38] sm:$0xff]  }
 0x2a4   :  { %3433 = vmatpush1.bf16.msra.mxu1 %v4682_v55 }
 0x2a5   :  { %3434 = vmatprep.subr.bf16.mxu1 %v4687_v44 }
 0x2a8   :  { %3435 = vmatpush1.bf16.msra.mxu1 %v4685_v60 }
 0x2a9   :  { %3436 = vmatprep.subr.bf16.mxu1 %v4690_v45 }
 0x2ac   :  { %3437 = vmatpush1.bf16.msra.mxu1 %v4688_v49 }
 0x2ad   :  { %3438 = vmatprep.subr.bf16.mxu1 %v4693_v56 }
 0x2b0   :  { %3439 = vmatpush1.bf16.msra.mxu1 %v4691_v52 }
 0x2b1   :  { %3440 = vmatprep.subr.bf16.mxu1 %v4696_v53 }
 0x2b4   :  { %3441 = vmatpush1.bf16.msra.mxu1 %v4694_v0 }
 0x2b5   :  { %3451 = vmatprep.subr.bf16.mxu1 %v4699_v62  ;;  %v4757_v62 = vld [vmem:[#allocation12 + $0x70] sm:$0xff]  }
 0x2b6   :  { %4103 = vmatprep.subr.bf16.mxu0 %v4757_v62 }
 0x2b7   :  { %3443 = vmatmul.mubr.bf16.vlgmr.msra.gmra.mrb[4].mxu1 %v2777_v14  ;;  %4104 = vmatpush3.bf16.msra.mxu0 %v4758_v27  ;;  %v2877_v14 = vld [vmem:[#allocation11] sm:$0x3] }
 0x2b8   :  { %3452 = vmatpush1.bf16.msra.mxu1 %v4697_v59  ;;  %v4759_v59 = vld [vmem:[#allocation12 + $0x78] sm:$0xff]   ;;  %v2886_v5 = vrot.slane %v2877_v14, %v936_v3 }
 0x2b9   :  { %3453 = vmatprep.subr.bf16.mxu1 %v4702_v46  ;;  %4105 = vmatprep.subr.bf16.mxu0 %v4759_v59  ;;  %v2882_v46 = vrot.slane %v2877_v14, %v932_v58 }
 0x2bb   :  { %4106 = vmatpush3.bf16.msra.mxu0 %v4760_v2 }
 0x2bc   :  { %3454 = vmatpush1.bf16.msra.mxu1 %v4700_v50 }
 0x2bd   :  { %3455 = vmatprep.subr.bf16.mxu1 %v4705_v36 }
 0x2c0   :  { %3456 = vmatpush1.bf16.msra.mxu1 %v4703_v61 }
 0x2c1   :  { %3457 = vmatprep.subr.bf16.mxu1 %v4708_v40 }
 0x2c4   :  { %3458 = vmatpush1.bf16.msra.mxu1 %v4706_v16 }
 0x2c5   :  { %3459 = vmatprep.subr.bf16.mxu1 %v4711_v18  ;;  %v4074_v18 = vld [vmem:[#allocation14] ss:$0 sm:$0xff] }
 0x2c8   :  { %3460 = vmatpush1.bf16.msra.mxu1 %v4709_v15 }
 0x2c9   :  { %3461 = vmatprep.subr.bf16.mxu1 %v4714_v19 }
 0x2cc   :  { %3462 = vmatpush1.bf16.msra.mxu1 %v4712_v28 }
 0x2cd   :  { %3463 = vmatprep.subr.bf16.mxu1 %v4717_v30 }
 0x2d0   :  { %3464 = vmatpush1.bf16.msra.mxu1 %v4715_v8 }
 0x2d1   :  { %3465 = vmatprep.subr.bf16.mxu1 %v4720_v22 }
 0x2d4   :  { %3466 = vmatpush1.bf16.msra.mxu1 %v4718_v24 }
 0x2d5   :  { %3467 = vmatprep.subr.bf16.mxu1 %v4723_v9 }
 0x2d8   :  { %3468 = vmatpush1.bf16.msra.mxu1 %v4721_v43 }
 0x2d9   :  { %3469 = vmatprep.subr.bf16.mxu1 %v4726_v26 }
 0x2dc   :  { %3470 = vmatpush1.bf16.msra.mxu1 %v4724_v34 }
 0x2dd   :  { %3471 = vmatprep.subr.bf16.mxu1 %v4729_v35 }
 0x2e0   :  { %3472 = vmatpush1.bf16.msra.mxu1 %v4727_v6 }
 0x2e1   :  { %3473 = vmatprep.subr.bf16.mxu1 %v4732_v31 }
 0x2e4   :  { %3474 = vmatpush1.bf16.msra.mxu1 %v4730_v29 }
 0x2e5   :  { %3475 = vmatprep.subr.bf16.mxu1 %v4735_v51 }
 0x2e8   :  { %3476 = vmatpush1.bf16.msra.mxu1 %v4733_v38 }
 0x2e9   :  { %3477 = vmatprep.subr.bf16.mxu1 %v4738_v12 }
 0x2ec   :  { %3478 = vmatpush1.bf16.msra.mxu1 %v4736_v37 }
 0x2ed   :  { %3479 = vmatprep.subr.bf16.mxu1 %v4741_v39 }
 0x2f0   :  { %3480 = vmatpush1.bf16.msra.mxu1 %v4739_v57 }
 0x2f1   :  { %3481 = vmatprep.subr.bf16.mxu1 %v4744_v42 }
 0x2f4   :  { %3482 = vmatpush1.bf16.msra.mxu1 %v4742_v47 }
 0x325   :  { %v2762_v55 = vpop.f32.mrb[4].mxu0 }
 0x326   :  { %v4117_v44 = vadd.f32 %v2762_v55, %v949_v4  ;;  %v2764_v13 = vpop.f32.mrb[5].mxu0 }
 0x327   :  { %v4118_v60 = vadd.f32 %v2764_v13, %v953_v33  ;;  %v2766_v45 = vpop.f32.mrb[6].mxu0 }
 0x328   :  { %4771 = vtanh.f32 %v4117_v44  ;;  %v2767_v49 = vpop.f32.mrb[7].mxu0 }
 0x329   :  { %4773 = vtanh.f32 %v4118_v60 }
 0x332   :  { %v4772_v56 = vpop.eup %4771 }
 0x333   :  { %v4774_v52 = vpop.eup %4773  ;;  %v2779_v0 = vpack.c.bf16 %v4772_v56, %v4772_v56 }
 0x334   :  { %v2780_v53 = vpack.c.bf16 %v4774_v52, %v4774_v52 }
 0x336   :  { %3483 = vmatprep.mubr.bf16.mxu1 %v2780_v53 }
 0x337   :  { %3484 = vmatmul.mubr.bf16.vlgmr.msra.gmra.mrb[4].mxu1 %v2779_v0 }
 0x40a   :  { %v3485_v7 = vpop.f32.mrb[4].mxu1 }
 0x40b   :  { %v4119_v23 = vadd.f32 %v3485_v7, %v2882_v46  ;;  %v3487_v50 = vpop.f32.mrb[5].mxu1 }
 0x40c   :  { %v4120_v36 = vadd.f32 %v3487_v50, %v2886_v5  ;;  %v3489_v21 = vpop.f32.mrb[6].mxu1 }
 0x40d   :  { %v3492_v11 = vmax.f32 %v4119_v23, 0.0  ;;  %v3490_v61 = vpop.f32.mrb[7].mxu1 }
 0x40e   :  { %v3493_v40 = vmax.f32 %v4120_v36, 0.0 }
 0x40f   :  { %v3494_v20 = vpack.c.bf16 %v3492_v11, %v3492_v11 }
 0x410   :  { %v3495_v10 = vpack.c.bf16 %v3493_v40, %v3493_v40 }
 0x412   :  { %3663 = vmatprep.mubr.bf16.mxu0 %v3495_v10 }
 0x413   :  { %3664 = vmatmul.mubr.bf16.vlgmr.msra.gmra.mrb[8].mxu0 %v3494_v20 }
 0x4e6   :  { %v4107_v16 = vpop.f32.mrb[8].mxu0 }
 0x4e7   :  { %v4108_v17 = vpop.f32.mrb[9].mxu0 }
 0x4e8   :  { %v4109_v58 = vadd.f32 %v4108_v17, %v4107_v16  ;;  %v4110_v1 = vpop.f32.mrb[10].mxu0 }
 0x4e9   :  { %v4111_v3 = vpop.f32.mrb[11].mxu0 }
 0x4ea   :  { %v3666_v25 = vadd.f32 %v4109_v58, %v4074_v18 }
 0x4ec   :  { %3671 = vst [vmem:[#allocation15] sm:$0xff] %v3666_v25 }
 0x4ed   :  { %4940 = shalt.err (!%p4937_p4)
}
 0x4ee   :  { %s4941_s25 = scalar_lea.hbm %s5376_s8, 128 }
 0x4ef   :  { %p4942_p5 = scmp.ne.s32.totalorder %s5376_s8, %s4941_s25  ;;  %p4945_p6 = scmp.lt.u32.totalorder %s4941_s25, %s5376_s8 }
 0x4f1   :  { %p4947_p7 = pnand %p4945_p6, %p4942_p5 }
 0x4f3   :  { %4950 = shalt.err (!%p4947_p7)
}
 0x4f4   :  { %3681 = dma.vmem_to_hbm [thread:$0]  %s3679_s7, 128, %s5376_s8, [#allocation5]  }
 0x4f5   :  { %4959 = dma.done.wait [#allocation5], 128  }
 0x4f6   :  { %4960 = vsyncadd [#allocation5], 4294967168 }
 0x4f7   :  { %3685 = vsyncpa [#allocation4], 1 }
 0x4f8   :  { %3686 = vsyncpa [#allocation7], 1 }
 0x4f9   :  { %3687 = vsyncpa [#allocation10], 1 }
 0x4fa   :  { %3688 = vsyncpa [#allocation13], 1 }
 0x4fb   :  { %3689 = vsyncpa [#allocation5], 1 }

</bundles_post_ra>
